<compile_context>
chip_gen: v7x
topology: tpu7x:2x2x1
jax: 0.10.0
libtpu: 0.0.40
codegen_flags: <defaults>
</compile_context>

<pallas_src>
import functools
import math

import jax
import jax.numpy as jnp
from jax import lax
from jax.experimental import pallas as pl
from jax.experimental.pallas import tpu as pltpu

MASK_VALUE = -jnp.finfo(jnp.float32).max  # -torch.finfo(float32).max
L2_EPS = 1e-12                            # F.normalize eps


def _knn_attn_kernel(scale_ref, q_ref, k_ref, v_ref, mask_ref,
                     memk_ref, memv_ref, memmask_ref, o_ref,
                     *, num_heads, q_per_head, mxu_dtype):
    # One (batch, HI-tile) per grid step; rows are (head, query) pairs r = h*I + i.
    T_HI, D = q_ref.shape

    q = q_ref[...].astype(jnp.float32)            # (T_HI, D)
    k = k_ref[...].astype(jnp.float32)            # (J, D)   fetched once per batch
    mask = mask_ref[...].astype(jnp.float32)      # (1, J)   1.0 = keep

    # Per-row exp(scale): rows of this tile are r = t*T_HI + [0, T_HI); head
    # boundaries are multiples of q_per_head, so H `where`s on the row index
    # replace the old padded (HI, 1) VMEM scale input.
    rows = pl.program_id(1) * T_HI + lax.broadcasted_iota(jnp.int32, (T_HI, 1), 0)
    scale_col = jnp.zeros((T_HI, 1), jnp.float32)
    for h in range(num_heads):
        scale_col = jnp.where(rows >= h * q_per_head, scale_ref[h], scale_col)

    # l2norm (F.normalize, dim=-1) via rsqrt (EUP path); fold scale into q once
    # (it multiplies sim and sim_mem identically).
    qn = q * lax.rsqrt(jnp.maximum(jnp.sum(q * q, -1, keepdims=True), L2_EPS * L2_EPS))
    kn = k * lax.rsqrt(jnp.maximum(jnp.sum(k * k, -1, keepdims=True), L2_EPS * L2_EPS))
    qs = qn * scale_col                            # (T_HI, D), f32

    # Local logits: bf16 operands on the MXU, f32 accumulation; the additive
    # key-padding mask stays f32 (MASK_VALUE is not bf16-representable).
    sim = lax.dot_general(qs.astype(mxu_dtype), kn.astype(mxu_dtype),
                          (((1,), (1,)), ((), ())),
                          preferred_element_type=jnp.float32)     # (T_HI, J)
    sim = sim + MASK_VALUE * (1.0 - mask)

    # Memory logits: one stacked broadcast-multiply-reduce over D, K on lanes.
    # Kept f32 on the VPU (v5e has no bf16 VALU).
    memk = memk_ref[...].astype(jnp.float32)                      # (T_HI, K, D)
    sim_mem = jnp.sum(qs[:, None, :] * memk, axis=-1)             # (T_HI, K)
    sim_mem = jnp.where(memmask_ref[...] > 0.5, sim_mem, MASK_VALUE)

    # Stable softmax over concat([sim_mem, sim], -1) without materializing it:
    # shared row max + shared denominator.
    m = jnp.maximum(jnp.max(sim, -1, keepdims=True),
                    jnp.max(sim_mem, -1, keepdims=True))          # (T_HI, 1)
    p_loc = jnp.exp(sim - m)                                      # (T_HI, J)
    p_mem = jnp.exp(sim_mem - m)                                  # (T_HI, K)
    denom = (jnp.sum(p_loc, -1, keepdims=True)
             + jnp.sum(p_mem, -1, keepdims=True))                 # (T_HI, 1)
    inv = pl.reciprocal(denom, approx=False)                      # exact (per review)

    # local_out = attn_local @ v (MXU, bf16 x bf16 -> f32 accumulate);
    # mem_out   = sum_K attn_mem * mem_v (stacked f32 VPU reduce).
    out = jnp.dot((p_loc * inv).astype(mxu_dtype), v_ref[...].astype(mxu_dtype),
                  preferred_element_type=jnp.float32)             # (T_HI, D)
    memv = memv_ref[...].astype(jnp.float32)                      # (T_HI, K, D)
    out = out + jnp.sum((p_mem * inv)[:, :, None] * memv, axis=1)

    o_ref[...] = out.astype(o_ref.dtype)


def _pick_hi_tile(hi, max_tile=256):
    """Largest multiple-of-8 divisor of HI that is <= max_tile (so the HI-tile
    satisfies the (8, 128) block rule); whole HI if it already fits or no such
    divisor exists."""
    if hi <= max_tile:
        return hi
    for t in range(max_tile - (max_tile % 8), 7, -8):
        if hi % t == 0:
            return t
    return hi


def knn_attention(q, k, v, mask, mem_k, mem_v, mem_mask, scale_exp,
                  *, kv_dtype=jnp.bfloat16, max_hi_tile=256):
    """q: (B,H,I,D)  k,v: (B,J,D)  mask: (B,J)  mem_k/mem_v: (B,H,I,K,D)
    mem_mask: (B,H,I,K)  scale_exp: (H,)  ->  (B,H,I,D)."""
    B, H, I, D = q.shape
    J = k.shape[1]
    K = mem_k.shape[3]
    HI = H * I

    T_HI = _pick_hi_tile(HI, max_hi_tile)
    n_hi = HI // T_HI

    # Pad J to a multiple of 128 so the local path is lane-dense; padded keys
    # are zero and masked out by the same additive key-padding mask.
    J_pad = max(128, ((J + 127) // 128) * 128)
    mask_f = mask.astype(jnp.float32)
    if J_pad != J:
        k = jnp.pad(k, ((0, 0), (0, J_pad - J), (0, 0)))
        v = jnp.pad(v, ((0, 0), (0, J_pad - J), (0, 0)))
        mask_f = jnp.pad(mask_f, ((0, 0), (0, J_pad - J)))

    # Layout plumbing: contiguous reshapes only (no HBM transpose) + dtype
    # casts so the dominant mem_k/mem_v traffic streams in bf16.
    q_r = q.reshape(B, HI, D)
    memk_r = mem_k.reshape(B, HI, K, D).astype(kv_dtype)
    memv_r = mem_v.reshape(B, HI, K, D).astype(kv_dtype)
    memmask_r = mem_mask.reshape(B, HI, K).astype(jnp.float32)
    mask3 = mask_f.reshape(B, 1, J_pad)
    k_c = k.astype(kv_dtype)
    v_c = v.astype(kv_dtype)

    mxu_dtype = (jnp.bfloat16 if jnp.dtype(kv_dtype) == jnp.dtype(jnp.bfloat16)
                 else jnp.float32)
    kernel = functools.partial(_knn_attn_kernel, num_heads=H, q_per_head=I,
                               mxu_dtype=mxu_dtype)

    grid_spec = pltpu.PrefetchScalarGridSpec(
        num_scalar_prefetch=1,                     # exp(scale) per head -> SMEM
        grid=(B, n_hi),
        in_specs=[
            pl.BlockSpec((None, T_HI, D), lambda b, t, s: (b, t, 0)),        # q rows
            pl.BlockSpec((None, J_pad, D), lambda b, t, s: (b, 0, 0)),       # k (once/batch)
            pl.BlockSpec((None, J_pad, D), lambda b, t, s: (b, 0, 0)),       # v (once/batch)
            pl.BlockSpec((None, 1, J_pad), lambda b, t, s: (b, 0, 0)),       # key-pad mask
            pl.BlockSpec((None, T_HI, K, D), lambda b, t, s: (b, t, 0, 0)),  # mem_k
            pl.BlockSpec((None, T_HI, K, D), lambda b, t, s: (b, t, 0, 0)),  # mem_v
            pl.BlockSpec((None, T_HI, K), lambda b, t, s: (b, t, 0)),        # mem_mask
        ],
        out_specs=pl.BlockSpec((None, T_HI, D), lambda b, t, s: (b, t, 0)),
    )

    out = pl.pallas_call(
        kernel,
        out_shape=jax.ShapeDtypeStruct((B, HI, D), q.dtype),
        grid_spec=grid_spec,
        compiler_params=pltpu.CompilerParams(
            dimension_semantics=("parallel", "parallel")),
    )(scale_exp.astype(jnp.float32), q_r, k_c, v_c, mask3, memk_r, memv_r, memmask_r)

    return out.reshape(B, H, I, D)                 # contiguous, free


def knn_attention_reference(q, k, v, mask, mem_k, mem_v, mem_mask, scale_exp):
    """Pure-JAX reference mirroring the PyTorch forward (f32 throughout)."""
    qn = q / jnp.maximum(jnp.linalg.norm(q, axis=-1, keepdims=True), L2_EPS)
    kn = k / jnp.maximum(jnp.linalg.norm(k, axis=-1, keepdims=True), L2_EPS)
    scale = scale_exp[None, :, None, None]
    sim = jnp.einsum('bhid,bjd->bhij', qn, kn) * scale
    sim = sim + MASK_VALUE * (1.0 - mask[:, None, None, :])
    sim_mem = jnp.einsum('bhid,bhikd->bhik', qn, mem_k) * scale
    sim_mem = jnp.where(mem_mask > 0.5, sim_mem, MASK_VALUE)
    full = jnp.concatenate([sim_mem, sim], axis=-1)
    full = full - jnp.max(full, axis=-1, keepdims=True)
    attn = jax.nn.softmax(full, axis=-1)
    K = mem_k.shape[3]
    local_attn, mem_attn = attn[..., K:], attn[..., :K]
    local_out = jnp.einsum('bhij,bjd->bhid', local_attn, v)
    mem_out = jnp.einsum('bhik,bhikd->bhid', mem_attn, mem_v)
    return local_out + mem_out


if __name__ == "__main__":
    # module config (small): heads=4, dim_head=32, num_retrieved_memories=4.
    # NOTE: demo shapes only — benchmark at production I/J/K before tuning.
    B, H, I, J, D, K = 2, 4, 8, 8, 32, 4
    ATTN_SCALE_INIT = 20.0

    key = jax.random.PRNGKey(0)
    kq, kk_, kv, km, kmk, kmv, kmm = jax.random.split(key, 7)

    q = jax.random.normal(kq, (B, H, I, D), dtype=jnp.float32)
    k = jax.random.normal(kk_, (B, J, D), dtype=jnp.float32)
    v = jax.random.normal(kv, (B, J, D), dtype=jnp.float32)
    mask = (jax.random.uniform(km, (B, J)) > 0.2).astype(jnp.float32)   # key padding mask
    mem_k = jax.random.normal(kmk, (B, H, I, K, D), dtype=jnp.float32)
    mem_v = jax.random.normal(kmv, (B, H, I, K, D), dtype=jnp.float32)
    mem_mask = (jax.random.uniform(kmm, (B, H, I, K)) > 0.3).astype(jnp.float32)

    # nn.Parameter(torch.ones(heads,1,1) * log(attn_scale_init)); forward uses .exp()
    scale_param = jnp.ones((H,), dtype=jnp.float32) * math.log(ATTN_SCALE_INIT)
    scale_exp = jnp.exp(scale_param)

    out = knn_attention(q, k, v, mask, mem_k, mem_v, mem_mask, scale_exp)
    out = jax.block_until_ready(out)

    ref = knn_attention_reference(q, k, v, mask, mem_k, mem_v, mem_mask, scale_exp)
    ref = jax.block_until_ready(ref)

    assert out.shape == (B, H, I, D)
    # Tolerance covers the (requested) bf16 KV streaming + bf16 MXU operands at
    # the learned x20 logit scale; pass kv_dtype=jnp.float32 to knn_attention
    # for a full-precision stream.
    assert jnp.allclose(out, ref, rtol=3e-2, atol=3e-2), (
        f"max abs diff: {jnp.max(jnp.abs(out - ref))}")

    print("KERNEL_OK")
</pallas_src>

<mosaic_0001>
module attributes {stable_mosaic.version = 11 : i64} {
  func.func @_knn_attn_kernel(%arg0: i32, %arg1: i32, %arg2: memref<4xf32, #tpu.memory_space<smem>>, %arg3: memref<1x32x32xf32, #tpu.memory_space<vmem>>, %arg4: memref<1x128x32xbf16, #tpu.memory_space<vmem>>, %arg5: memref<1x128x32xbf16, #tpu.memory_space<vmem>>, %arg6: memref<1x1x128xf32, #tpu.memory_space<vmem>>, %arg7: memref<1x32x4x32xbf16, #tpu.memory_space<vmem>>, %arg8: memref<1x32x4x32xbf16, #tpu.memory_space<vmem>>, %arg9: memref<1x32x4xf32, #tpu.memory_space<vmem>>, %arg10: memref<1x32x32xf32, #tpu.memory_space<vmem>>) attributes {dimension_semantics = [#tpu.dimension_semantics<parallel>, #tpu.dimension_semantics<parallel>], iteration_bounds = array<i64: 2, 1>, scalar_prefetch = 1 : i64, scratch_operands = 0 : i64, tpu.core_type = #tpu.core_type<tc>, window_params = [{transform_indices = @transform_0, window_bounds = array<i64: 1, 32, 32>}, {transform_indices = @transform_1, window_bounds = array<i64: 1, 128, 32>}, {transform_indices = @transform_2, window_bounds = array<i64: 1, 128, 32>}, {transform_indices = @transform_3, window_bounds = array<i64: 1, 1, 128>}, {transform_indices = @transform_4, window_bounds = array<i64: 1, 32, 4, 32>}, {transform_indices = @transform_5, window_bounds = array<i64: 1, 32, 4, 32>}, {transform_indices = @transform_6, window_bounds = array<i64: 1, 32, 4>}, {transform_indices = @transform_7, window_bounds = array<i64: 1, 32, 32>}]} {
    %c0 = arith.constant 0 : index
    %c0_0 = arith.constant 0 : index
    %c0_1 = arith.constant 0 : index
    %0 = vector.load %arg3[%c0, %c0_0, %c0_1] : memref<1x32x32xf32, #tpu.memory_space<vmem>>, vector<1x32x32xf32>
    %1 = vector.shape_cast %0 : vector<1x32x32xf32> to vector<32x32xf32>
    %c0_2 = arith.constant 0 : index
    %c0_3 = arith.constant 0 : index
    %c0_4 = arith.constant 0 : index
    %2 = vector.load %arg4[%c0_2, %c0_3, %c0_4] : memref<1x128x32xbf16, #tpu.memory_space<vmem>>, vector<1x128x32xbf16>
    %3 = vector.shape_cast %2 : vector<1x128x32xbf16> to vector<128x32xbf16>
    %4 = arith.extf %3 : vector<128x32xbf16> to vector<128x32xf32>
    %c0_5 = arith.constant 0 : index
    %c0_6 = arith.constant 0 : index
    %c0_7 = arith.constant 0 : index
    %5 = vector.load %arg6[%c0_5, %c0_6, %c0_7] : memref<1x1x128xf32, #tpu.memory_space<vmem>>, vector<1x1x128xf32>
    %6 = vector.shape_cast %5 : vector<1x1x128xf32> to vector<1x128xf32>
    %c32_i32 = arith.constant 32 : i32
    %7 = arith.muli %arg1, %c32_i32 : i32
    %8 = tpu.iota {dimensions = array<i32: 0>} : vector<32x1xi32>
    %9 = vector.broadcast %7 : i32 to vector<32x1xi32>
    %10 = arith.addi %9, %8 : vector<32x1xi32>
    %cst = arith.constant 0.000000e+00 : f32
    %11 = vector.broadcast %cst : f32 to vector<32x1xf32>
    %c0_i32 = arith.constant 0 : i32
    %12 = vector.broadcast %c0_i32 : i32 to vector<32x1xi32>
    %13 = arith.cmpi sge, %10, %12 : vector<32x1xi32>
    %c0_8 = arith.constant 0 : index
    %14 = memref.load %arg2[%c0_8] : memref<4xf32, #tpu.memory_space<smem>>
    %15 = vector.broadcast %14 : f32 to vector<32x1xf32>
    %16 = arith.select %13, %15, %11 : vector<32x1xi1>, vector<32x1xf32>
    %c8_i32 = arith.constant 8 : i32
    %17 = vector.broadcast %c8_i32 : i32 to vector<32x1xi32>
    %18 = arith.cmpi sge, %10, %17 : vector<32x1xi32>
    %c1 = arith.constant 1 : index
    %19 = memref.load %arg2[%c1] : memref<4xf32, #tpu.memory_space<smem>>
    %20 = vector.broadcast %19 : f32 to vector<32x1xf32>
    %21 = arith.select %18, %20, %16 : vector<32x1xi1>, vector<32x1xf32>
    %c16_i32 = arith.constant 16 : i32
    %22 = vector.broadcast %c16_i32 : i32 to vector<32x1xi32>
    %23 = arith.cmpi sge, %10, %22 : vector<32x1xi32>
    %c2 = arith.constant 2 : index
    %24 = memref.load %arg2[%c2] : memref<4xf32, #tpu.memory_space<smem>>
    %25 = vector.broadcast %24 : f32 to vector<32x1xf32>
    %26 = arith.select %23, %25, %21 : vector<32x1xi1>, vector<32x1xf32>
    %c24_i32 = arith.constant 24 : i32
    %27 = vector.broadcast %c24_i32 : i32 to vector<32x1xi32>
    %28 = arith.cmpi sge, %10, %27 : vector<32x1xi32>
    %c3 = arith.constant 3 : index
    %29 = memref.load %arg2[%c3] : memref<4xf32, #tpu.memory_space<smem>>
    %30 = vector.broadcast %29 : f32 to vector<32x1xf32>
    %31 = arith.select %28, %30, %26 : vector<32x1xi1>, vector<32x1xf32>
    %32 = arith.mulf %1, %1 : vector<32x32xf32>
    %cst_9 = arith.constant dense<0.000000e+00> : vector<32xf32>
    %33 = vector.multi_reduction <add>, %32, %cst_9 [1] : vector<32x32xf32> to vector<32xf32>
    %34 = vector.shape_cast %33 : vector<32xf32> to vector<32x1xf32>
    %cst_10 = arith.constant 1.000000e-24 : f32
    %35 = vector.broadcast %cst_10 : f32 to vector<32x1xf32>
    %36 = arith.maximumf %34, %35 : vector<32x1xf32>
    %37 = math.rsqrt %36 : vector<32x1xf32>
    %38 = vector.broadcast %37 : vector<32x1xf32> to vector<32x32xf32>
    %39 = arith.mulf %1, %38 : vector<32x32xf32>
    %40 = arith.mulf %4, %4 : vector<128x32xf32>
    %cst_11 = arith.constant dense<0.000000e+00> : vector<128xf32>
    %41 = vector.multi_reduction <add>, %40, %cst_11 [1] : vector<128x32xf32> to vector<128xf32>
    %42 = vector.shape_cast %41 : vector<128xf32> to vector<128x1xf32>
    %cst_12 = arith.constant 1.000000e-24 : f32
    %43 = vector.broadcast %cst_12 : f32 to vector<128x1xf32>
    %44 = arith.maximumf %42, %43 : vector<128x1xf32>
    %45 = math.rsqrt %44 : vector<128x1xf32>
    %46 = vector.broadcast %45 : vector<128x1xf32> to vector<128x32xf32>
    %47 = arith.mulf %4, %46 : vector<128x32xf32>
    %48 = vector.broadcast %31 : vector<32x1xf32> to vector<32x32xf32>
    %49 = arith.mulf %39, %48 : vector<32x32xf32>
    %50 = arith.truncf %49 : vector<32x32xf32> to vector<32x32xbf16>
    %51 = arith.truncf %47 : vector<128x32xf32> to vector<128x32xbf16>
    %cst_13 = arith.constant dense<0.000000e+00> : vector<32x128xf32>
    %52 = tpu.matmul %50, %51, %cst_13 {dimension_numbers = #tpu.dot_dimension_numbers<[1], [1], [0], [0], [0, 0, 1, 0], [], []>} : vector<32x32xbf16>, vector<128x32xbf16>, vector<32x128xf32> -> vector<32x128xf32>
    %cst_14 = arith.constant 1.000000e+00 : f32
    %53 = vector.broadcast %cst_14 : f32 to vector<1x128xf32>
    %54 = arith.subf %53, %6 : vector<1x128xf32>
    %cst_15 = arith.constant -3.40282347E+38 : f32
    %55 = vector.broadcast %cst_15 : f32 to vector<1x128xf32>
    %56 = arith.mulf %55, %54 : vector<1x128xf32>
    %57 = vector.broadcast %56 : vector<1x128xf32> to vector<32x128xf32>
    %58 = arith.addf %52, %57 : vector<32x128xf32>
    %c0_16 = arith.constant 0 : index
    %c0_17 = arith.constant 0 : index
    %c0_18 = arith.constant 0 : index
    %c0_19 = arith.constant 0 : index
    %59 = vector.load %arg7[%c0_16, %c0_17, %c0_18, %c0_19] : memref<1x32x4x32xbf16, #tpu.memory_space<vmem>>, vector<1x32x4x32xbf16>
    %60 = vector.shape_cast %59 : vector<1x32x4x32xbf16> to vector<32x4x32xbf16>
    %61 = arith.extf %60 : vector<32x4x32xbf16> to vector<32x4x32xf32>
    %62 = vector.shape_cast %49 : vector<32x32xf32> to vector<32x1x32xf32>
    %63 = vector.broadcast %62 : vector<32x1x32xf32> to vector<32x4x32xf32>
    %64 = arith.mulf %63, %61 : vector<32x4x32xf32>
    %cst_20 = arith.constant dense<0.000000e+00> : vector<32x4xf32>
    %65 = vector.multi_reduction <add>, %64, %cst_20 [2] : vector<32x4x32xf32> to vector<32x4xf32>
    %c0_21 = arith.constant 0 : index
    %c0_22 = arith.constant 0 : index
    %c0_23 = arith.constant 0 : index
    %66 = vector.load %arg9[%c0_21, %c0_22, %c0_23] : memref<1x32x4xf32, #tpu.memory_space<vmem>>, vector<1x32x4xf32>
    %67 = vector.shape_cast %66 : vector<1x32x4xf32> to vector<32x4xf32>
    %cst_24 = arith.constant 5.000000e-01 : f32
    %68 = vector.broadcast %cst_24 : f32 to vector<32x4xf32>
    %69 = arith.cmpf ogt, %67, %68 : vector<32x4xf32>
    %cst_25 = arith.constant -3.40282347E+38 : f32
    %70 = vector.broadcast %cst_25 : f32 to vector<32x4xf32>
    %71 = arith.select %69, %65, %70 : vector<32x4xi1>, vector<32x4xf32>
    %cst_26 = arith.constant dense<0xFF800000> : vector<32xf32>
    %72 = vector.multi_reduction <maximumf>, %58, %cst_26 [1] : vector<32x128xf32> to vector<32xf32>
    %73 = vector.shape_cast %72 : vector<32xf32> to vector<32x1xf32>
    %cst_27 = arith.constant dense<0xFF800000> : vector<32xf32>
    %74 = vector.multi_reduction <maximumf>, %71, %cst_27 [1] : vector<32x4xf32> to vector<32xf32>
    %75 = vector.shape_cast %74 : vector<32xf32> to vector<32x1xf32>
    %76 = arith.maximumf %73, %75 : vector<32x1xf32>
    %77 = vector.broadcast %76 : vector<32x1xf32> to vector<32x128xf32>
    %78 = arith.subf %58, %77 : vector<32x128xf32>
    %79 = math.exp %78 : vector<32x128xf32>
    %80 = vector.broadcast %76 : vector<32x1xf32> to vector<32x4xf32>
    %81 = arith.subf %71, %80 : vector<32x4xf32>
    %82 = math.exp %81 : vector<32x4xf32>
    %cst_28 = arith.constant dense<0.000000e+00> : vector<32xf32>
    %83 = vector.multi_reduction <add>, %79, %cst_28 [1] : vector<32x128xf32> to vector<32xf32>
    %84 = vector.shape_cast %83 : vector<32xf32> to vector<32x1xf32>
    %cst_29 = arith.constant dense<0.000000e+00> : vector<32xf32>
    %85 = vector.multi_reduction <add>, %82, %cst_29 [1] : vector<32x4xf32> to vector<32xf32>
    %86 = vector.shape_cast %85 : vector<32xf32> to vector<32x1xf32>
    %87 = arith.addf %84, %86 : vector<32x1xf32>
    %88 = tpu.reciprocal %87 : vector<32x1xf32> -> vector<32x1xf32>
    %89 = vector.broadcast %88 : vector<32x1xf32> to vector<32x128xf32>
    %90 = arith.mulf %79, %89 : vector<32x128xf32>
    %91 = arith.truncf %90 : vector<32x128xf32> to vector<32x128xbf16>
    %c0_30 = arith.constant 0 : index
    %c0_31 = arith.constant 0 : index
    %c0_32 = arith.constant 0 : index
    %92 = vector.load %arg5[%c0_30, %c0_31, %c0_32] : memref<1x128x32xbf16, #tpu.memory_space<vmem>>, vector<1x128x32xbf16>
    %93 = vector.shape_cast %92 : vector<1x128x32xbf16> to vector<128x32xbf16>
    %cst_33 = arith.constant dense<0.000000e+00> : vector<32x32xf32>
    %94 = tpu.matmul %91, %93, %cst_33 {dimension_numbers = #tpu.dot_dimension_numbers<[1], [0], [0], [1], [0, 0, 1, 1], [], []>} : vector<32x128xbf16>, vector<128x32xbf16>, vector<32x32xf32> -> vector<32x32xf32>
    %c0_34 = arith.constant 0 : index
    %c0_35 = arith.constant 0 : index
    %c0_36 = arith.constant 0 : index
    %c0_37 = arith.constant 0 : index
    %95 = vector.load %arg8[%c0_34, %c0_35, %c0_36, %c0_37] : memref<1x32x4x32xbf16, #tpu.memory_space<vmem>>, vector<1x32x4x32xbf16>
    %96 = vector.shape_cast %95 : vector<1x32x4x32xbf16> to vector<32x4x32xbf16>
    %97 = arith.extf %96 : vector<32x4x32xbf16> to vector<32x4x32xf32>
    %98 = vector.broadcast %88 : vector<32x1xf32> to vector<32x4xf32>
    %99 = arith.mulf %82, %98 : vector<32x4xf32>
    %100 = vector.shape_cast %99 : vector<32x4xf32> to vector<32x4x1xf32>
    %101 = vector.broadcast %100 : vector<32x4x1xf32> to vector<32x4x32xf32>
    %102 = arith.mulf %101, %97 : vector<32x4x32xf32>
    %cst_38 = arith.constant dense<0.000000e+00> : vector<32x32xf32>
    %103 = vector.multi_reduction <add>, %102, %cst_38 [1] : vector<32x4x32xf32> to vector<32x32xf32>
    %104 = arith.addf %94, %103 : vector<32x32xf32>
    %c0_39 = arith.constant 0 : index
    %c0_40 = arith.constant 0 : index
    %c0_41 = arith.constant 0 : index
    %105 = vector.load %arg10[%c0_39, %c0_40, %c0_41] : memref<1x32x32xf32, #tpu.memory_space<vmem>>, vector<1x32x32xf32>
    %106 = vector.shape_cast %105 : vector<1x32x32xf32> to vector<32x32xf32>
    %107 = vector.shape_cast %104 : vector<32x32xf32> to vector<1x32x32xf32>
    tpu.vector_store %arg10[%c0_39, %c0_40, %c0_41], %107 {strides = array<i32>} : memref<1x32x32xf32, #tpu.memory_space<vmem>>, vector<1x32x32xf32>,
    return
  }
  func.func @transform_0(%arg0: i32, %arg1: i32, %arg2: memref<4xf32, #tpu.memory_space<smem>>) -> (i32, i32, i32) {
    %c0_i32 = arith.constant 0 : i32
    %c0_i32_0 = arith.constant 0 : i32
    return %arg0, %arg1, %c0_i32 : i32, i32, i32
  }
  func.func @transform_1(%arg0: i32, %arg1: i32, %arg2: memref<4xf32, #tpu.memory_space<smem>>) -> (i32, i32, i32) {
    %c0_i32 = arith.constant 0 : i32
    %c0_i32_0 = arith.constant 0 : i32
    %c0_i32_1 = arith.constant 0 : i32
    return %arg0, %c0_i32, %c0_i32_0 : i32, i32, i32
  }
  func.func @transform_2(%arg0: i32, %arg1: i32, %arg2: memref<4xf32, #tpu.memory_space<smem>>) -> (i32, i32, i32) {
    %c0_i32 = arith.constant 0 : i32
    %c0_i32_0 = arith.constant 0 : i32
    %c0_i32_1 = arith.constant 0 : i32
    return %arg0, %c0_i32, %c0_i32_0 : i32, i32, i32
  }
  func.func @transform_3(%arg0: i32, %arg1: i32, %arg2: memref<4xf32, #tpu.memory_space<smem>>) -> (i32, i32, i32) {
    %c0_i32 = arith.constant 0 : i32
    %c0_i32_0 = arith.constant 0 : i32
    %c0_i32_1 = arith.constant 0 : i32
    return %arg0, %c0_i32, %c0_i32_0 : i32, i32, i32
  }
  func.func @transform_4(%arg0: i32, %arg1: i32, %arg2: memref<4xf32, #tpu.memory_space<smem>>) -> (i32, i32, i32, i32) {
    %c0_i32 = arith.constant 0 : i32
    %c0_i32_0 = arith.constant 0 : i32
    %c0_i32_1 = arith.constant 0 : i32
    return %arg0, %arg1, %c0_i32, %c0_i32_0 : i32, i32, i32, i32
  }
  func.func @transform_5(%arg0: i32, %arg1: i32, %arg2: memref<4xf32, #tpu.memory_space<smem>>) -> (i32, i32, i32, i32) {
    %c0_i32 = arith.constant 0 : i32
    %c0_i32_0 = arith.constant 0 : i32
    %c0_i32_1 = arith.constant 0 : i32
    return %arg0, %arg1, %c0_i32, %c0_i32_0 : i32, i32, i32, i32
  }
  func.func @transform_6(%arg0: i32, %arg1: i32, %arg2: memref<4xf32, #tpu.memory_space<smem>>) -> (i32, i32, i32) {
    %c0_i32 = arith.constant 0 : i32
    %c0_i32_0 = arith.constant 0 : i32
    return %arg0, %arg1, %c0_i32 : i32, i32, i32
  }
  func.func @transform_7(%arg0: i32, %arg1: i32, %arg2: memref<4xf32, #tpu.memory_space<smem>>) -> (i32, i32, i32) {
    %c0_i32 = arith.constant 0 : i32
    %c0_i32_0 = arith.constant 0 : i32
    return %arg0, %arg1, %c0_i32 : i32, i32, i32
  }
}

</mosaic_0001>

<bundles_post_ra>
// kernel: tpu_custom_call.1
= control target key start
LH: loop header
LB: loop body
LE: loop exit
PB: predicated region body
PF: predicated region fallthrough
CT: control target
= control target key end

     0   :  { %s4036_s0 = inlined_call_operand.vmem [shape: f32[4], index: 0, kind: input, shape index: {}]   ;;  %s4037_s1 = inlined_call_operand.vmem [shape: f32[2,32,32], index: 1, kind: input, shape index: {}]   ;;  %s4038_s2 = inlined_call_operand.vmem [shape: bf16[2,128,32], index: 2, kind: input, shape index: {}]   ;;  %s4039_s3 = inlined_call_operand.vmem [shape: bf16[2,128,32], index: 3, kind: input, shape index: {}]   ;;  %s4040_s4 = inlined_call_operand.vmem [shape: f32[2,1,128], index: 4, kind: input, shape index: {}]   ;;  %s4041_s5 = inlined_call_operand.vmem [shape: bf16[2,32,4,32], index: 5, kind: input, shape index: {}]   ;;  %s4042_s6 = inlined_call_operand.vmem [shape: bf16[2,32,4,32], index: 6, kind: input, shape index: {}]   ;;  %s4043_s7 = inlined_call_operand.vmem [shape: f32[2,32,4], index: 7, kind: input, shape index: {}]   ;;  %s4044_s8 = inlined_call_operand.hbm [shape: f32[2,32,32], index: 8, kind: output, shape index: {}]  }
   0x1   :  { %s13_s29 = sshll.u32 %s4036_s0, 4  ;;  %s14_s29 = int_to_ptr.vmem [resolvable:$true] %s13_s29 }
   0x2   :  { %s2849_s30 = scalar_lea.vmem %s14_s29, 16  ;;  %p2854_p1 = scmp.lt.s32.totalorder %s14_s29, %s14_s29 }
   0x3   :  { %p2850_p0 = scmp.ne.s32.totalorder %s14_s29, %s2849_s30  ;;  %p2855_p2 = scmp.lt.s32.totalorder %s2849_s30, %s2849_s30 }
   0x5   :  { %p2856_p3 = por %p2855_p2, %p2854_p1 }
   0x7   :  { %p2857_p4 = pnand %p2856_p3, %p2850_p0 }
   0x9   :  { %2860 = shalt.err (!%p2857_p4)  }
   0xa   :  { %s2943_s9 = smov [#allocation3]  }
   0xb   :  { %16 = dma.vmem_to_smem %s14_s29, 16, %s2943_s9, [#allocation2] }
   0xc   :  { %2913 = dma.done.wait [#allocation2], 16 }
   0xd   :  { %2914 = vsyncadd [#allocation2], 4294967280 }
   0xe   :  { %18 = sfence }
   0xf   :  { %19 = vsyncpa [#allocation5], 0 }
  0x10   :  { %21 = vsyncpa [#allocation5 + $0x1], 0  ;;  %s2996_s10 = smov 0   ;;  %s2998_s11 = smov 0  }
  0x11   :  { %s3000_s0 = smov 0   ;;  %s3002_s12 = smov 0  }
  0x12   :  { %s3004_s13 = smov 0   ;;  %s3006_s14 = smov 0  }
  0x13 LB: > { %s2568_s15 = sadd.s32 4294967295, %s2941_s14   ;;  %s2569_s16 = sadd.s32 4294967294, %s2941_s14   ;;  %s2941_s14 = sphi %s3006_s14, %s27_s14   ;;  %s2937_s13 = sphi %s3004_s13, %s4072_s13   ;;  %s2933_s12 = sphi %s3002_s12, %s4071_s12   ;;  %s2929_s0 = sphi %s3000_s0, %s4070_s0   ;;  %s2925_s11 = sphi %s2998_s11, %s4069_s11   ;;  %s2921_s10 = sphi %s2996_s10, %s4068_s10  }
  0x14   : > { %s39_s17 = sadd.s32 1, %s2937_s13  ;;  %s238_s18 = sadd.s32 1, %s2929_s0 }
  0x15   : > { %p41_p5 = scmp.ge.s32.totalorder %s39_s17, 2  ;;  %p248_p6 = scmp.ne.s32.totalorder %s2929_s0, %s2925_s11 }
  0x16   : > { %p249_p7 = scmp.eq.s32.totalorder %s2568_s15, 1  ;;  %p254_p8 = scmp.ne.s32.totalorder %s2925_s11, %s2921_s10 }
  0x17   : > { %s4074_s17 = smov (%p41_p5, %s39_s17), 0  ;;  %p255_p10 = scmp.eq.s32.totalorder %s2569_s16, 1 }
  0x18   : > { %p3036_p9 = por %p249_p7, %p248_p6  ;;  %s233_s20 = ssub.s32 %s2937_s13, %s4074_s17 }
  0x19   : > { %p2572_p11 = scmp.ge.s32.totalorder %s2941_s14, 1  ;;  %p236_p12 = scmp.eq.s32.totalorder %s233_s20, 0 }
  0x1a   : > { %p3043_p13 = por %p255_p10, %p254_p8  ;;  %p347_p0 = scmp.lt.s32.totalorder %s2941_s14, 3 }
  0x1b   : > { %s3049_s22 = scalar_select %p236_p12, %s2929_s0, %s238_s18  }
  0x1c   : > { %p348_p1 = pnand %p2572_p11, %p347_p0 }
  0x1e   : > { %351 = sbr.rel (%p348_p1) target bundleno = 1062 (0x426), region = 48 }
  0x25   : > { %p424_p2 = scmp.lt.s32.totalorder %s2933_s12, 1  ;;  %vm570_vm0 = vcmask 261120   ;;  %s3201_s20 = sld [smem:[#allocation3]]  ;;  %vm1264_vm1 = vcmask 257024   ;;  %vm1531_vm2 = vcmask 1041409   ;;  %vm1533_vm3 = vcmask 1042434  }
  0x26   : > { %s3204_s25 = sld [smem:[#allocation3 + $0x1]]  ;;  %s3206_s26 = sld [smem:[#allocation3 + $0x2]]  ;;  %vm1535_vm4 = vcmask 1043459   ;;  %vm1537_vm5 = vcmask 1044484   ;;  %vm1539_vm6 = vcmask 1045509   ;;  %vm1541_vm7 = vcmask 1046534  }
  0x27   : > { %s3053_s23 = scalar_select %p424_p2, %s2933_s12, 1  ;;  %vm1543_vm8 = vcmask 1047559   ;;  %vm1582_vm10 = vcmask 31744  }
  0x28   : > { %s2610_s16 = sshll.u32 %s2933_s12, 9 }
  0x29   : > { %s3056_s24 = sshll.u32 %s3053_s23, 6  ;;  %s2604_s9 = sshll.u32 %s3053_s23, 5 }
  0x2a   : > { %s3062_s27 = scalar_lea.vmem %s4038_s2, %s3056_s24  ;;  %s3083_s30 = scalar_lea.vmem %s4039_s3, %s3056_s24 }
  0x2b   : > { %v2612_v0 = vld [vmem:[%s3062_s27] sm:$0xff]   ;;  %v2643_v1 = vld [vmem:[%s3062_s27 + $0x8] sm:$0xff]   ;;  %v2644_v2 = vld [vmem:[%s3062_s27 + $0x10] sm:$0xff]   ;;  %s431_s18 = scalar_lea.vmem %s4037_s1, %s2604_s9  ;;  %s3217_s15 = scalar_lea.vmem %s4041_s5, %s3056_s24 }
  0x2c   : > { %v3067_v3 = vunpack.c.l.bf16 %v2612_v0  ;;  %v3069_v4 = vunpack.c.l.bf16 %v2643_v1  ;;  %v3071_v5 = vunpack.c.h.bf16 %v2612_v0  ;;  %v3073_v6 = vunpack.c.h.bf16 %v2643_v1  ;;  %v2645_v13 = vld [vmem:[%s3062_s27 + $0x18] sm:$0xff]   ;;  %v2646_v20 = vld [vmem:[%s3062_s27 + $0x20] sm:$0xff]   ;;  %v2647_v29 = vld [vmem:[%s3062_s27 + $0x28] sm:$0xff]  }
  0x2d   : > { %v3075_v7 = vunpack.c.l.bf16 %v2644_v2  ;;  %v3077_v8 = vunpack.c.h.bf16 %v2644_v2  ;;  %v3098_v18 = vunpack.c.l.bf16 %v2645_v13  ;;  %v3100_v19 = vunpack.c.h.bf16 %v2645_v13  ;;  %v2648_v36 = vld [vmem:[%s3062_s27 + $0x30] sm:$0xff]   ;;  %v2649_v43 = vld [vmem:[%s3062_s27 + $0x38] sm:$0xff]   ;;  %v3162_v54 = vld [vmem:[%s431_s18] sm:$0xff]  ;;  %s3211_s27 = sld [smem:[#allocation3 + $0x3]] }
  0x2e   : > { %v595_v9 = vmul.f32 %v3067_v3, %v3067_v3  ;;  %v597_v10 = vmul.f32 %v3069_v4, %v3069_v4  ;;  %v596_v11 = vmul.f32 %v3071_v5, %v3071_v5  ;;  %v598_v12 = vmul.f32 %v3073_v6, %v3073_v6  ;;  %v3164_v55 = vld [vmem:[%s431_s18 + $0x8] sm:$0xff]  ;;  %v3172_v60 = vld [vmem:[%s431_s18 + $0x10] sm:$0xff]  ;;  %v3174_v61 = vld [vmem:[%s431_s18 + $0x18] sm:$0xff] }
  0x2f   : > { %v599_v21 = vmul.f32 %v3075_v7, %v3075_v7  ;;  %v600_v22 = vmul.f32 %v3077_v8, %v3077_v8  ;;  %v601_v23 = vmul.f32 %v3098_v18, %v3098_v18  ;;  %v602_v24 = vmul.f32 %v3100_v19, %v3100_v19 }
  0x30   : > { %v611_v14 = vsel %vm570_vm0, %v595_v9, 0.0  ;;  %v617_v15 = vsel %vm570_vm0, %v597_v10, 0.0  ;;  %v614_v16 = vsel %vm570_vm0, %v596_v11, 0.0  ;;  %v620_v17 = vsel %vm570_vm0, %v598_v12, 0.0 }
  0x31   : > { %612 = vadd.xlane.f32.xlu0 %v611_v14  ;;  %618 = vadd.xlane.f32.xlu1 %v617_v15  ;;  %v623_v25 = vsel %vm570_vm0, %v599_v21, 0.0  ;;  %v626_v26 = vsel %vm570_vm0, %v600_v22, 0.0  ;;  %v3113_v27 = vunpack.c.l.bf16 %v2646_v20  ;;  %v3115_v28 = vunpack.c.h.bf16 %v2646_v20 }
  0x32   : > { %v629_v30 = vsel %vm570_vm0, %v601_v23, 0.0  ;;  %v632_v31 = vsel %vm570_vm0, %v602_v24, 0.0  ;;  %v3124_v34 = vunpack.c.l.bf16 %v2647_v29  ;;  %v3126_v35 = vunpack.c.h.bf16 %v2647_v29 }
  0x33   : > { %v603_v32 = vmul.f32 %v3113_v27, %v3113_v27  ;;  %v604_v33 = vmul.f32 %v3115_v28, %v3115_v28  ;;  %v3129_v37 = vunpack.c.l.bf16 %v2648_v36  ;;  %v3131_v38 = vunpack.c.h.bf16 %v2648_v36 }
  0x34   : > { %v605_v41 = vmul.f32 %v3124_v34, %v3124_v34  ;;  %v606_v42 = vmul.f32 %v3126_v35, %v3126_v35  ;;  %v3140_v44 = vunpack.c.l.bf16 %v2649_v43  ;;  %v3142_v45 = vunpack.c.h.bf16 %v2649_v43 }
  0x35   : > { %615 = vadd.xlane.f32.xlu0 %v614_v16  ;;  %621 = vadd.xlane.f32.xlu1 %v620_v17  ;;  %v635_v39 = vsel %vm570_vm0, %v603_v32, 0.0  ;;  %v638_v40 = vsel %vm570_vm0, %v604_v33, 0.0  ;;  %v607_v48 = vmul.f32 %v3129_v37, %v3129_v37  ;;  %v608_v49 = vmul.f32 %v3131_v38, %v3131_v38 }
  0x36   : > { %v641_v46 = vsel %vm570_vm0, %v605_v41, 0.0  ;;  %v644_v47 = vsel %vm570_vm0, %v606_v42, 0.0  ;;  %v609_v52 = vmul.f32 %v3140_v44, %v3140_v44  ;;  %v610_v53 = vmul.f32 %v3142_v45, %v3142_v45 }
  0x37   : > { %v647_v50 = vsel %vm570_vm0, %v607_v48, 0.0  ;;  %v650_v51 = vsel %vm570_vm0, %v608_v49, 0.0  ;;  %v566_v58 = vmul.f32 %v3162_v54, %v3162_v54  ;;  %v567_v59 = vmul.f32 %v3164_v55, %v3164_v55 }
  0x38   : > { %v653_v56 = vsel %vm570_vm0, %v609_v52, 0.0  ;;  %v656_v57 = vsel %vm570_vm0, %v610_v53, 0.0  ;;  %v568_v0 = vmul.f32 %v3172_v60, %v3172_v60  ;;  %v569_v1 = vmul.f32 %v3174_v61, %v3174_v61 }
  0x39   : > { %624 = vadd.xlane.f32.xlu0 %v623_v25  ;;  %627 = vadd.xlane.f32.xlu1 %v626_v26  ;;  %v571_v62 = vsel %vm570_vm0, %v566_v58, 0.0  ;;  %v574_v63 = vsel %vm570_vm0, %v567_v59, 0.0 }
  0x3a   : > { %v577_v2 = vsel %vm570_vm0, %v568_v0, 0.0  ;;  %v580_v9 = vsel %vm570_vm0, %v569_v1, 0.0 }
  0x3d   : > { %630 = vadd.xlane.f32.xlu0 %v629_v30  ;;  %633 = vadd.xlane.f32.xlu1 %v632_v31 }
  0x41   : > { %636 = vadd.xlane.f32.xlu0 %v635_v39  ;;  %639 = vadd.xlane.f32.xlu1 %v638_v40 }
  0x45   : > { %642 = vadd.xlane.f32.xlu0 %v641_v46  ;;  %645 = vadd.xlane.f32.xlu1 %v644_v47 }
  0x49   : > { %648 = vadd.xlane.f32.xlu0 %v647_v50  ;;  %651 = vadd.xlane.f32.xlu1 %v650_v51 }
  0x4d   : > { %654 = vadd.xlane.f32.xlu0 %v653_v56  ;;  %657 = vadd.xlane.f32.xlu1 %v656_v57 }
  0x51   : > { %572 = vadd.xlane.f32.xlu0 %v571_v62  ;;  %575 = vadd.xlane.f32.xlu1 %v574_v63 }
  0x55   : > { %578 = vadd.xlane.f32.xlu0 %v577_v2  ;;  %581 = vadd.xlane.f32.xlu1 %v580_v9 }
  0xbe   : > { %v613_v10 = vpop.xlane.xlu0 %612  ;;  %v619_v11 = vpop.xlane.xlu1 %618 }
  0xbf   : > { %v659_v12 = vmax.f32 %v613_v10, 1e-24  ;;  %v661_v13 = vmax.f32 %v619_v11, 1e-24 }
  0xc1   : > { %2785 = vrsqrt.f32 %v661_v13 }
  0xc2   : > { %v616_v14 = vpop.xlane.xlu0 %615  ;;  %v622_v15 = vpop.xlane.xlu1 %621  ;;  %2787 = vrsqrt.f32 %v659_v12 }
  0xc3   : > { %v660_v16 = vmax.f32 %v616_v14, 1e-24  ;;  %v662_v17 = vmax.f32 %v622_v15, 1e-24  ;;  %v724_v14 = vlaneseq }
  0xc5   : > { %2789 = vrsqrt.f32 %v660_v16 }
  0xc6   : > { %2791 = vrsqrt.f32 %v662_v17  ;;  %v625_v20 = vpop.xlane.xlu0 %624  ;;  %v628_v21 = vpop.xlane.xlu1 %627 }
  0xc7   : > { %v663_v22 = vmax.f32 %v625_v20, 1e-24  ;;  %v664_v23 = vmax.f32 %v628_v21, 1e-24 }
  0xc9   : > { %2793 = vrsqrt.f32 %v663_v22  ;;  %v2944_v22 = vmov 1966171168  }
  0xca   : > { %2795 = vrsqrt.f32 %v664_v23  ;;  %v631_v24 = vpop.xlane.xlu0 %630  ;;  %v634_v25 = vpop.xlane.xlu1 %633  ;;  %v878_v23 = vunpack.c.l.s4 %v2944_v22 }
  0xcb   : > { %v2786_v26 = vpop.eup %2785  ;;  %v665_v29 = vmax.f32 %v631_v24, 1e-24  ;;  %v666_v31 = vmax.f32 %v634_v25, 1e-24 }
  0xcc   : > { %v2788_v30 = vpop.eup %2787  ;;  %v693_v39 = vmul.f32 %v2786_v26, %v3069_v4  ;;  %v3209_v26 = vshrl.u32 %v724_v14, 7 }
  0xcd   : > { %2797 = vrsqrt.f32 %v665_v29  ;;  %v691_v41 = vmul.f32 %v2788_v30, %v3067_v3 }
  0xce   : > { %v637_v32 = vpop.xlane.xlu0 %636  ;;  %v640_v33 = vpop.xlane.xlu1 %639  ;;  %2799 = vrsqrt.f32 %v666_v31  ;;  %v879_v31 = vunpack.c.0.s8 %v878_v23 }
  0xcf   : > { %v2790_v36 = vpop.eup %2789  ;;  %v667_v52 = vmax.f32 %v637_v32, 1e-24  ;;  %v668_v53 = vmax.f32 %v640_v33, 1e-24 }
  0xd0   : > { %v2792_v40 = vpop.eup %2791  ;;  %v692_v42 = vmul.f32 %v2790_v36, %v3071_v5  ;;  %v531_v36 = vstv %s3201_s20  ;;  %s3543_s20 = scalar_lea.vmem %s4043_s7, %s2604_s9 }
  0xd1   : > { %v694_v43 = vmul.f32 %v2792_v40, %v3073_v6  ;;  %2801 = vrsqrt.f32 %v667_v52  ;;  %v3227_v40 = vld [vmem:[%s3217_s15 + $0x2] sm:$0x3]  ;;  %v3247_v52 = vld [vmem:[%s3217_s15 + $0x20] sm:$0x3] }
  0xd2   : > { %v643_v46 = vpop.xlane.xlu0 %642  ;;  %v713_v47 = vpack.c.bf16 %v692_v42, %v691_v41  ;;  %v646_v48 = vpop.xlane.xlu1 %645  ;;  %2803 = vrsqrt.f32 %v668_v53 }
  0xd3   : > { %v2794_v49 = vpop.eup %2793  ;;  %v714_v50 = vpack.c.bf16 %v694_v43, %v693_v39  ;;  %v669_v57 = vmax.f32 %v643_v46, 1e-24  ;;  %v670_v59 = vmax.f32 %v646_v48, 1e-24  ;;  %v3224_v39 = vld [vmem:[%s3217_s15] sm:$0x3] }
  0xd4   : > { %v2796_v51 = vpop.eup %2795  ;;  %2710 = vmatprep.subr.msk.bf16.mxu0 %vm570_vm0, %v713_v47  ;;  %v736_v4 = vsel %vm570_vm0, %v713_v47, 0  ;;  %v695_v5 = vmul.f32 %v2794_v49, %v3075_v7  ;;  %v3237_v43 = vld [vmem:[%s3217_s15 + $0x10] sm:$0x3]  ;;  %v3240_v46 = vld [vmem:[%s3217_s15 + $0x12] sm:$0x3] }
  0xd5   : > { %2671 = vmatpush3.bf16.xpose.msra.mxu0 %v736_v4  ;;  %v696_v6 = vmul.f32 %v2796_v51, %v3077_v8  ;;  %v739_v2 = vsel %vm570_vm0, %v714_v50, 0  ;;  %2805 = vrsqrt.f32 %v669_v57  ;;  %v541_v51 = vstv %s3204_s25  ;;  %v3250_v4 = vld [vmem:[%s3217_s15 + $0x14] sm:$0x3]  ;;  %v3257_v57 = vld [vmem:[%s3217_s15 + $0x30] sm:$0x3] }
  0xd6   : > { %v649_v56 = vpop.xlane.xlu0 %648  ;;  %2711 = vmatprep.subr.msk.bf16.mxu0 %vm570_vm0, %v714_v50  ;;  %v652_v3 = vpop.xlane.xlu1 %651  ;;  %2807 = vrsqrt.f32 %v670_v59  ;;  %v561_v59 = vstv %s3211_s27  ;;  %s3660_s27 = scalar_lea.vmem %s4042_s6, %s3056_s24  ;;  %s420_s24 = sand.u32 1, %s2925_s11  }
  0xd7   : > { %v2798_v58 = vpop.eup %2797  ;;  %v715_v0 = vpack.c.bf16 %v696_v6, %v695_v5  ;;  %v671_v13 = vmax.f32 %v649_v56, 1e-24  ;;  %v840_v5 = vunpack.c.l.bf16 %v3224_v39  ;;  %v551_v6 = vstv %s3206_s26  ;;  %s445_s26 = scalar_lea.vmem %s4040_s4, %s3053_s23  ;;  %s2573_s28 = sshll.u32 %s420_s24, 5 }
  0xd8   : > { %v2800_v1 = vpop.eup %2799  ;;  %v697_v8 = vmul.f32 %v2798_v58, %v3098_v18  ;;  %v848_v58 = vunpack.c.l.bf16 %v3237_v43  ;;  %s422_s29 = scalar_lea.vmem [#allocation4], %s2573_s28  ;;  %s3990_s9 = scalar_lea.sflag [#allocation5], %s420_s24 }
  0xd9   : > { %v698_v10 = vmul.f32 %v2800_v1, %v3100_v19  ;;  %v742_v16 = vsel %vm570_vm0, %v715_v0, 0  ;;  %v672_v19 = vmax.f32 %v652_v3, 1e-24  ;;  %v856_v1 = vunpack.c.l.bf16 %v3247_v52 }
  0xda   : > { %v3193_v62 = vpop.xlane.xlu0 %654  ;;  %v3195_v63 = vpop.xlane.xlu1 %657 }
  0xdb   : > { %v2802_v15 = vpop.eup %2801  ;;  %v716_v21 = vpack.c.bf16 %v698_v10, %v697_v8  ;;  %v673_v48 = vmax.f32 %v3193_v62, 1e-24  ;;  %v674_v56 = vmax.f32 %v3195_v63, 1e-24  ;;  %v3264_v62 = vld [vmem:[%s3217_s15 + $0x22] sm:$0x3]  ;;  %v849_v63 = vunpack.c.l.bf16 %v3240_v46 }
  0xdc   : > { %v2804_v18 = vpop.eup %2803  ;;  %v699_v29 = vmul.f32 %v2802_v15, %v3113_v27  ;;  %v3231_v27 = vsub.s32 0, %v3209_v26  ;;  %v864_v8 = vunpack.c.l.bf16 %v3257_v57 }
  0xdd   : > { %2673 = vmatpush3.bf16.xpose.msra.mxu0 %v739_v2  ;;  %v700_v30 = vmul.f32 %v2804_v18, %v3115_v28  ;;  %v745_v41 = vsel %vm570_vm0, %v716_v21, 0  ;;  %v3234_v28 = vsub.s32 %v879_v31, %v3209_v26 }
  0xde   : > { %v573_v9 = vpop.xlane.xlu0 %572  ;;  %v576_v7 = vpop.xlane.xlu1 %575  ;;  %2712 = vmatprep.subr.msk.bf16.mxu0 %vm570_vm0, %v715_v0 }
  0xdf   : > { %v583_v11 = vmax.f32 %v573_v9, 1e-24  ;;  %v584_v12 = vmax.f32 %v576_v7, 1e-24  ;;  %v2806_v32 = vpop.eup %2805  ;;  %v717_v42 = vpack.c.bf16 %v700_v30, %v699_v29 }
  0xe0   : > { %v2808_v33 = vpop.eup %2807  ;;  %v701_v49 = vmul.f32 %v2806_v32, %v3124_v34 }
  0xe1   : > { %2809 = vrsqrt.f32 %v583_v11  ;;  %v702_v50 = vmul.f32 %v2808_v33, %v3126_v35  ;;  %v841_v35 = vunpack.c.l.bf16 %v3227_v40 }
  0xe2   : > { %2811 = vrsqrt.f32 %v584_v12  ;;  %v579_v17 = vpop.xlane.xlu0 %578  ;;  %v582_v20 = vpop.xlane.xlu1 %581 }
  0xe3   : > { %v585_v24 = vmax.f32 %v579_v17, 1e-24  ;;  %v586_v25 = vmax.f32 %v582_v20, 1e-24  ;;  %2813 = vrsqrt.f32 %v671_v13  ;;  %v718_v9 = vpack.c.bf16 %v702_v50, %v701_v49 }
  0xe4   : > { %v857_v13 = vunpack.c.l.bf16 %v3264_v62  ;;  %v748_v17 = vsel %vm570_vm0, %v717_v42, 0 }
  0xe5   : > { %2675 = vmatpush3.bf16.xpose.msra.mxu0 %v742_v16  ;;  %2815 = vrsqrt.f32 %v585_v24 }
  0xe6   : > { %2817 = vrsqrt.f32 %v586_v25  ;;  %2713 = vmatprep.subr.msk.bf16.mxu0 %vm570_vm0, %v716_v21 }
  0xe7   : > { %2819 = vrsqrt.f32 %v672_v19  ;;  %v751_v19 = vsel %vm570_vm0, %v718_v9, 0 }
  0xe8   : > { %2821 = vrsqrt.f32 %v673_v48 }
  0xe9   : > { %2823 = vrsqrt.f32 %v674_v56 }
  0xeb   : > { %v2810_v47 = vpop.eup %2809 }
  0xec   : > { %v2812_v53 = vpop.eup %2811  ;;  %v591_v3 = vmul.f32 %v2810_v47, %v3162_v54 }
  0xed   : > { %v592_v34 = vmul.f32 %v2812_v53, %v3164_v55  ;;  %2677 = vmatpush3.bf16.xpose.msra.mxu0 %v745_v41  ;;  %v2814_v0 = vpop.eup %2813  ;;  %v850_v55 = vunpack.c.l.bf16 %v3250_v4 }
  0xee   : > { %2714 = vmatprep.subr.msk.bf16.mxu0 %vm570_vm0, %v717_v42  ;;  %v3267_v54 = vmul.f32 %v591_v3, %v531_v36  ;;  %v703_v18 = vmul.f32 %v2814_v0, %v3129_v37  ;;  %v810_v0 = vld [vmem:[%s3217_s15 + $0x4] sm:$0x3] }
  0xef   : > { %v2816_v2 = vpop.eup %2815  ;;  %v3272_v7 = vmul.f32 %v592_v34, %v541_v51 }
  0xf0   : > { %v2818_v10 = vpop.eup %2817  ;;  %v593_v11 = vmul.f32 %v2816_v2, %v3172_v60  ;;  %v883_v12 = vrot.slane %v3267_v54, %v3234_v28 }
  0xf1   : > { %v2820_v15 = vpop.eup %2819  ;;  %v594_v16 = vmul.f32 %v2818_v10, %v3174_v61  ;;  %v932_v20 = vrot.slane %v3272_v7, %v3234_v28  ;;  %v711_v21 = vpack.c.bf16 %v3272_v7, %v3267_v54  ;;  %v925_v10 = vcombine.high %v3272_v7, %v3272_v7 }
  0xf2   : > { %v899_v22 = vrot.slane %v883_v12, %v3234_v28  ;;  %v891_v23 = vcombine.high %v883_v12, %v883_v12  ;;  %v3286_v60 = vmul.f32 %v593_v11, %v551_v6  ;;  %v704_v32 = vmul.f32 %v2820_v15, %v3131_v38  ;;  %v2822_v4 = vpop.eup %2821  ;;  %v833_v12 = vld [vmem:[%s3217_s15 + $0x32] sm:$0x3] }
  0xf3   : > { %v948_v24 = vrot.slane %v932_v20, %v3234_v28  ;;  %v940_v61 = vcombine.high %v932_v20, %v932_v20  ;;  %v3291_v25 = vmul.f32 %v594_v16, %v561_v59  ;;  %2686 = vmatprep.mubr.msk.bf16.mxu0 %vm570_vm0, %v711_v21  ;;  %v2824_v6 = vpop.eup %2823  ;;  %v705_v11 = vmul.f32 %v2822_v4, %v3140_v44  ;;  %v826_v44 = vld [vmem:[%s3217_s15 + $0x24] sm:$0x3] }
  0xf4   : > { %v1075_v29 = vrot.slane %v899_v22, %v3231_v27  ;;  %v3296_v30 = vrot.slane %v891_v23, %v3234_v28  ;;  %v981_v31 = vrot.slane %v3286_v60, %v3234_v28  ;;  %v719_v56 = vpack.c.bf16 %v704_v32, %v703_v18 }
  0xf5   : > { %2679 = vmatpush3.bf16.xpose.msra.mxu0 %v748_v17  ;;  %v1107_v37 = vrot.slane %v948_v24, %v3231_v27  ;;  %v3303_v33 = vrot.slane %v940_v61, %v3234_v28  ;;  %v970_v36 = vcombine.high %v948_v24, %v948_v24  ;;  %v1030_v39 = vrot.slane %v3291_v25, %v3234_v28 }
  0xf6   : > { %v1232_v40 = vmul.f32 %v1075_v29, %v840_v5  ;;  %v1079_v41 = vrot.slane %v3296_v30, %v3231_v27  ;;  %2715 = vmatprep.subr.msk.bf16.mxu0 %vm570_vm0, %v718_v9  ;;  %v997_v42 = vrot.slane %v981_v31, %v3234_v28  ;;  %v989_v43 = vcombine.high %v981_v31, %v981_v31 }
  0xf7   : > { %v1240_v38 = vmul.f32 %v1107_v37, %v848_v58  ;;  %v1111_v46 = vrot.slane %v3303_v33, %v3231_v27  ;;  %v1115_v47 = vrot.slane %v970_v36, %v3231_v27  ;;  %v1046_v48 = vrot.slane %v1030_v39, %v3234_v28  ;;  %v812_v36 = vld [vmem:[%s3217_s15 + $0x8] sm:$0x3] }
  0xf8   : > { %v1265_v49 = vsel %vm1264_vm1, %v1232_v40, 0.0  ;;  %v1233_v50 = vmul.f32 %v1079_v41, %v841_v35  ;;  %v1139_v51 = vrot.slane %v997_v42, %v3231_v27  ;;  %v3318_v52 = vrot.slane %v989_v43, %v3234_v28 }
  0xf9   : > { %1266 = vadd.xlane.f32.xlu0 %v1265_v49  ;;  %v1241_v53 = vmul.f32 %v1111_v46, %v849_v63  ;;  %v921_v3 = vcombine.high %v899_v22, %v899_v22  ;;  %v876_v5 = vcombine.high %v3267_v54, %v3267_v54  ;;  %v1289_v58 = vsel %vm1264_vm1, %v1240_v38, 0.0  ;;  %v820_v46 = vld [vmem:[%s3217_s15 + $0x18] sm:$0x3] }
  0xfa   : > { %v1268_v34 = vsel %vm1264_vm1, %v1233_v50, 0.0  ;;  %v1248_v35 = vmul.f32 %v1139_v51, %v856_v1  ;;  %v1171_v59 = vrot.slane %v1046_v48, %v3231_v27  ;;  %v1242_v2 = vmul.f32 %v1115_v47, %v850_v55 }
  0xfb   : > { %1269 = vadd.xlane.f32.xlu1 %v1268_v34  ;;  %v1143_v63 = vrot.slane %v3318_v52, %v3231_v27  ;;  %v1038_v9 = vcombine.high %v1030_v39, %v1030_v39  ;;  %v1292_v54 = vsel %vm1264_vm1, %v1241_v53, 0.0  ;;  %v842_v1 = vunpack.c.l.bf16 %v810_v0  ;;  %v828_v53 = vld [vmem:[%s3217_s15 + $0x28] sm:$0x3] }
  0xfc   : > { %v1083_v15 = vrot.slane %v921_v3, %v3231_v27  ;;  %v706_v55 = vmul.f32 %v2824_v6, %v3142_v45  ;;  %v1313_v17 = vsel %vm1264_vm1, %v1248_v35, 0.0  ;;  %v1256_v7 = vmul.f32 %v1171_v59, %v864_v8  ;;  %v834_v8 = vld [vmem:[%s3217_s15 + $0x34] sm:$0x3] }
  0xfd   : > { %2681 = vmatpush3.bf16.xpose.msra.mxu0 %v751_v19  ;;  %1290 = vadd.xlane.f32.xlu0 %v1289_v58  ;;  %v3336_v16 = vrot.slane %v1038_v9, %v3234_v28  ;;  %v1019_v20 = vcombine.high %v997_v42, %v997_v42  ;;  %v3344_v21 = vrot.slane %v876_v5, %v3234_v28  ;;  %v1295_v22 = vsel %vm1264_vm1, %v1242_v2, 0.0  ;;  %v836_v58 = vld [vmem:[%s3217_s15 + $0x38] sm:$0x3]  ;;  %v811_v9 = vld [vmem:[%s3217_s15 + $0x6] sm:$0x3] }
  0xfe   : > { %2716 = vmatprep.subr.msk.bf16.mxu0 %vm570_vm0, %v719_v56  ;;  %v1249_v45 = vmul.f32 %v1143_v63, %v857_v13  ;;  %v865_v23 = vunpack.c.l.bf16 %v833_v12  ;;  %v3350_v18 = vrot.slane %v925_v10, %v3234_v28  ;;  %v1068_v19 = vcombine.high %v1046_v48, %v1046_v48 }
  0xff   : > { %1293 = vadd.xlane.f32.xlu1 %v1292_v54  ;;  %v1175_v57 = vrot.slane %v3336_v16, %v3231_v27  ;;  %v974_v24 = vcombine.high %v3286_v60, %v3286_v60  ;;  %v1023_v61 = vcombine.high %v3291_v25, %v3291_v25  ;;  %v754_v62 = vsel %vm570_vm0, %v719_v56, 0 }
 0x100   : > { %v1234_v13 = vmul.f32 %v1083_v15, %v842_v1  ;;  %v720_v29 = vpack.c.bf16 %v706_v55, %v705_v11  ;;  %v858_v31 = vunpack.c.l.bf16 %v826_v44  ;;  %v1337_v32 = vsel %vm1264_vm1, %v1256_v7, 0.0  ;;  %v819_v55 = vld [vmem:[%s3217_s15 + $0x16] sm:$0x3] }
 0x101   : > { %1314 = vadd.xlane.f32.xlu0 %v1313_v17  ;;  %v1147_v37 = vrot.slane %v1019_v20, %v3231_v27  ;;  %v3365_v39 = vrot.slane %v3344_v21, %v3234_v28  ;;  %v3368_v40 = vrot.slane %v974_v24, %v3234_v28  ;;  %v1316_v41 = vsel %vm1264_vm1, %v1249_v45, 0.0 }
 0x102   : > { %v866_v42 = vunpack.c.l.bf16 %v834_v8  ;;  %v1257_v43 = vmul.f32 %v1175_v57, %v865_v23  ;;  %v1179_v38 = vrot.slane %v1068_v19, %v3231_v27  ;;  %v3375_v47 = vrot.slane %v3350_v18, %v3234_v28 }
 0x103   : > { %1296 = vadd.xlane.f32.xlu1 %v1295_v22  ;;  %v3378_v48 = vrot.slane %v1023_v61, %v3234_v28  ;;  %v844_v49 = vunpack.c.l.bf16 %v812_v36  ;;  %v1271_v50 = vsel %vm1264_vm1, %v1234_v13, 0.0  ;;  %v1250_v51 = vmul.f32 %v1147_v37, %v858_v31  ;;  %v827_v22 = vld [vmem:[%s3217_s15 + $0x26] sm:$0x3]  ;;  %v835_v61 = vld [vmem:[%s3217_s15 + $0x36] sm:$0x3] }
 0x104   : > { %v1091_v4 = vrot.slane %v3365_v39, %v3231_v27  ;;  %v3387_v56 = vrot.slane %v3368_v40, %v3234_v28  ;;  %v852_v3 = vunpack.c.l.bf16 %v820_v46  ;;  %v1340_v5 = vsel %vm1264_vm1, %v1257_v43, 0.0  ;;  %v813_v37 = vld [vmem:[%s3217_s15 + $0xa] sm:$0x3]  ;;  %v821_v43 = vld [vmem:[%s3217_s15 + $0x1a] sm:$0x3] }
 0x105   : > { %2683 = vmatpush3.bf16.xpose.msra.mxu0 %v754_v62  ;;  %1338 = vadd.xlane.f32.xlu0 %v1337_v32  ;;  %v1258_v6 = vmul.f32 %v1179_v38, %v866_v42  ;;  %v1123_v34 = vrot.slane %v3375_v47, %v3231_v27  ;;  %v3395_v35 = vrot.slane %v3378_v48, %v3234_v28  ;;  %v860_v59 = vunpack.c.l.bf16 %v828_v53 }
 0x106   : > { %2717 = vmatprep.subr.msk.bf16.mxu0 %vm570_vm0, %v720_v29  ;;  %v1319_v0 = vsel %vm1264_vm1, %v1250_v51, 0.0  ;;  %v1236_v2 = vmul.f32 %v1091_v4, %v844_v49  ;;  %v1155_v63 = vrot.slane %v3387_v56, %v3231_v27  ;;  %v923_v10 = vcombine.high %v3296_v30, %v3296_v30  ;;  %v814_v51 = vld [vmem:[%s3217_s15 + $0xc] sm:$0x3] }
 0x107   : > { %1317 = vadd.xlane.f32.xlu1 %v1316_v41  ;;  %v757_v54 = vsel %vm570_vm0, %v720_v29, 0  ;;  %v868_v11 = vunpack.c.l.bf16 %v836_v58  ;;  %v1343_v12 = vsel %vm1264_vm1, %v1258_v6, 0.0  ;;  %v1244_v1 = vmul.f32 %v1123_v34, %v852_v3 }
 0x108   : > { %v1187_v15 = vrot.slane %v3395_v35, %v3231_v27  ;;  %v972_v17 = vcombine.high %v3303_v33, %v3303_v33  ;;  %v843_v7 = vunpack.c.l.bf16 %v811_v9  ;;  %v1277_v30 = vsel %vm1264_vm1, %v1236_v2, 0.0 }
 0x109   : > { %1272 = vadd.xlane.f32.xlu0 %v1271_v50  ;;  %v1252_v44 = vmul.f32 %v1155_v63, %v860_v59  ;;  %v1087_v20 = vrot.slane %v923_v10, %v3231_v27  ;;  %v1021_v45 = vcombine.high %v3318_v52, %v3318_v52  ;;  %v712_v23 = vpack.c.bf16 %v3291_v25, %v3286_v60  ;;  %v829_v63 = vld [vmem:[%s3217_s15 + $0x2a] sm:$0x3] }
 0x10a   : > { %v851_v57 = vunpack.c.l.bf16 %v819_v55  ;;  %v1070_v33 = vcombine.high %v3336_v16, %v3336_v16  ;;  %v1301_v8 = vsel %vm1264_vm1, %v1244_v1, 0.0  ;;  %v1260_v19 = vmul.f32 %v1187_v15, %v868_v11  ;;  %v837_v11 = vld [vmem:[%s3217_s15 + $0x3a] sm:$0x3] }
 0x10b   : > { %1341 = vadd.xlane.f32.xlu1 %v1340_v5  ;;  %v1119_v24 = vrot.slane %v972_v17, %v3231_v27  ;;  %v892_v62 = vcombine.high %v3344_v21, %v3344_v21  ;;  %v859_v52 = vunpack.c.l.bf16 %v827_v22  ;;  %v1325_v13 = vsel %vm1264_vm1, %v1252_v44, 0.0  ;;  %v830_v17 = vld [vmem:[%s3217_s15 + $0x2c] sm:$0x3]  ;;  %v838_v22 = vld [vmem:[%s3217_s15 + $0x3c] sm:$0x3] }
 0x10c   : > { %v1235_v60 = vmul.f32 %v1087_v20, %v843_v7  ;;  %v1151_v25 = vrot.slane %v1021_v45, %v3231_v27  ;;  %v941_v16 = vcombine.high %v3350_v18, %v3350_v18  ;;  %v867_v29 = vunpack.c.l.bf16 %v835_v61 }
 0x10d   : > { %2685 = vmatpush3.bf16.xpose.msra.mxu0 %v757_v54  ;;  %1320 = vadd.xlane.f32.xlu0 %v1319_v0  ;;  %v1183_v31 = vrot.slane %v1070_v33, %v3231_v27  ;;  %v1349_v21 = vsel %vm1264_vm1, %v1260_v19, 0.0  ;;  %v1243_v32 = vmul.f32 %v1119_v24, %v851_v57  ;;  %v3433_v36 = vrot.slane %v892_v62, %v3234_v28 }
 0x10e   : > { %v1274_v41 = vsel %vm1264_vm1, %v1235_v60, 0.0  ;;  %v1251_v42 = vmul.f32 %v1151_v25, %v859_v52  ;;  %v3438_v18 = vrot.slane %v941_v16, %v3234_v28  ;;  %v845_v46 = vunpack.c.l.bf16 %v813_v37 }
 0x10f   : > { %1344 = vadd.xlane.f32.xlu1 %v1343_v12  ;;  %v1259_v38 = vmul.f32 %v1183_v31, %v867_v29  ;;  %v1298_v49 = vsel %vm1264_vm1, %v1243_v32, 0.0  ;;  %v1095_v50 = vrot.slane %v3433_v36, %v3231_v27  ;;  %v922_v4 = vcombine.high %v3365_v39, %v3365_v39  ;;  %v822_v39 = vld [vmem:[%s3217_s15 + $0x1c] sm:$0x3]  ;;  %v831_v32 = vld [vmem:[%s3217_s15 + $0x2e] sm:$0x3] }
 0x110   : > { %v990_v53 = vcombine.high %v3368_v40, %v3368_v40  ;;  %v853_v3 = vunpack.c.l.bf16 %v821_v43  ;;  %v1322_v5 = vsel %vm1264_vm1, %v1251_v42, 0.0  ;;  %v1127_v6 = vrot.slane %v3438_v18, %v3231_v27  ;;  %v839_v43 = vld [vmem:[%s3217_s15 + $0x3e] sm:$0x3] }
 0x111   : > { %1278 = vadd.xlane.f32.xlu0 %v1277_v30  ;;  %v971_v34 = vcombine.high %v3375_v47, %v3375_v47  ;;  %v1039_v58 = vcombine.high %v3378_v48, %v3378_v48  ;;  %v846_v59 = vunpack.c.l.bf16 %v814_v51  ;;  %v1346_v0 = vsel %vm1264_vm1, %v1259_v38, 0.0 }
 0x112   : > { %v1237_v40 = vmul.f32 %v1095_v50, %v845_v46  ;;  %v1099_v2 = vrot.slane %v922_v4, %v3231_v27  ;;  %v1018_v9 = vrot.slane %v990_v53, %v3234_v28  ;;  %v1245_v10 = vmul.f32 %v1127_v6, %v853_v3 }
 0x113   : > { %1302 = vadd.xlane.f32.xlu1 %v1301_v8  ;;  %v854_v54 = vunpack.c.l.bf16 %v822_v39  ;;  %v1131_v47 = vrot.slane %v971_v34, %v3231_v27  ;;  %v1067_v48 = vrot.slane %v1039_v58, %v3234_v28  ;;  %v861_v12 = vunpack.c.l.bf16 %v829_v63 }
 0x114   : > { %2687 = vmatmul.mubr.msk.bf16.vlgmr.msra.gmra.mrb[0].mxu0 %vm570_vm0, %v712_v23  ;;  %v1280_v1 = vsel %vm1264_vm1, %v1237_v40, 0.0  ;;  %v1238_v15 = vmul.f32 %v1099_v2, %v846_v59  ;;  %v1159_v55 = vrot.slane %v1018_v9, %v3231_v27  ;;  %v1020_v7 = vcombine.high %v3387_v56, %v3387_v56  ;;  %v815_v56 = vld [vmem:[%s3217_s15 + $0xe] sm:$0x3] }
 0x115   : > { %1326 = vadd.xlane.f32.xlu0 %v1325_v13  ;;  %v869_v30 = vunpack.c.l.bf16 %v837_v11  ;;  %v1304_v44 = vsel %vm1264_vm1, %v1245_v10, 0.0  ;;  %v1246_v20 = vmul.f32 %v1131_v47, %v854_v54  ;;  %v1191_v28 = vrot.slane %v1067_v48, %v3231_v27 }
 0x116   : > { %v1069_v45 = vcombine.high %v3395_v35, %v3395_v35  ;;  %v862_v23 = vunpack.c.l.bf16 %v830_v17  ;;  %v1283_v57 = vsel %vm1264_vm1, %v1238_v15, 0.0  ;;  %v1253_v33 = vmul.f32 %v1159_v55, %v861_v12  ;;  %v823_v35 = vld [vmem:[%s3217_s15 + $0x1e] sm:$0x3]  ;;  %s2402_s15 = sshll.u32 %s422_s29, 4  ;;  %s3977_s15 = int_to_ptr.vmem [resolvable:$true] %s2402_s15 }
 0x117   : > { %1350 = vadd.xlane.f32.xlu1 %v1349_v21  ;;  %v1163_v8 = vrot.slane %v1020_v7, %v3231_v27  ;;  %v924_v19 = vcombine.high %v3433_v36, %v3433_v36  ;;  %v870_v24 = vunpack.c.l.bf16 %v838_v22  ;;  %v1307_v61 = vsel %vm1264_vm1, %v1246_v20, 0.0  ;;  %s2861_s25 = scalar_lea.vmem %s3977_s15, 512 }
 0x118   : > { %v1261_v62 = vmul.f32 %v1191_v28, %v869_v30  ;;  %v1195_v52 = vrot.slane %v1069_v45, %v3231_v27  ;;  %v973_v13 = vcombine.high %v3438_v18, %v3438_v18  ;;  %v847_v60 = vunpack.c.l.bf16 %v815_v56  ;;  %p2862_p3 = scmp.ne.s32.totalorder %s3977_s15, %s2861_s25 }
 0x119   : > { %1275 = vadd.xlane.f32.xlu0 %v1274_v41  ;;  %v1328_v25 = vsel %vm1264_vm1, %v1253_v33, 0.0  ;;  %v1254_v16 = vmul.f32 %v1163_v8, %v862_v23  ;;  %v1103_v29 = vrot.slane %v924_v19, %v3231_v27  ;;  %v1022_v31 = vcombine.high %v1018_v9, %v1018_v9 }
 0x11a   : > { %v855_v21 = vunpack.c.l.bf16 %v823_v35  ;;  %v1352_v37 = vsel %vm1264_vm1, %v1261_v62, 0.0  ;;  %v1262_v36 = vmul.f32 %v1195_v52, %v870_v24  ;;  %v1135_v41 = vrot.slane %v973_v13, %v3231_v27  ;;  %p2863_p4 = pnand %p2862_p3, %p3036_p9 }
 0x11b   : > { %1299 = vadd.xlane.f32.xlu1 %v1298_v49  ;;  %v1071_v42 = vcombine.high %v1067_v48, %v1067_v48  ;;  %v1331_v18 = vsel %vm1264_vm1, %v1254_v16, 0.0  ;;  %v1239_v38 = vmul.f32 %v1103_v29, %v847_v60  ;;  %v863_v46 = vunpack.c.l.bf16 %v831_v32 }
 0x11c   : > { %v1167_v49 = vrot.slane %v1022_v31, %v3231_v27  ;;  %v1355_v50 = vsel %vm1264_vm1, %v1262_v36, 0.0  ;;  %v1247_v51 = vmul.f32 %v1135_v41, %v855_v21  ;;  %v871_v4 = vunpack.c.l.bf16 %v839_v43  ;;  %p2864_p5 = pneg %p2863_p4 }
 0x11d   : > { %1323 = vadd.xlane.f32.xlu0 %v1322_v5  ;;  %v1199_v53 = vrot.slane %v1071_v42, %v3231_v27  ;;  %v1286_v3 = vsel %vm1264_vm1, %v1239_v38, 0.0  ;;  %v1402_v40 = vand.u32 127, %v724_v14 }
 0x11e   : > { %v1255_v5 = vmul.f32 %v1167_v49, %v863_v46  ;;  %v1310_v6 = vsel %vm1264_vm1, %v1247_v51, 0.0 }
 0x11f   : > { %1347 = vadd.xlane.f32.xlu1 %v1346_v0  ;;  %v1263_v34 = vmul.f32 %v1199_v53, %v871_v4  ;;  %v3499_v9 = vsub.s32 %v1402_v40, %v3209_v26 }
 0x120   : > { %v1334_v58 = vsel %vm1264_vm1, %v1255_v5, 0.0 }
 0x121   : > { %1281 = vadd.xlane.f32.xlu0 %v1280_v1  ;;  %v1358_v59 = vsel %vm1264_vm1, %v1263_v34, 0.0 }
 0x123   : > { %1305 = vadd.xlane.f32.xlu1 %v1304_v44 }
 0x125   : > { %1284 = vadd.xlane.f32.xlu0 %v1283_v57 }
 0x127   : > { %1308 = vadd.xlane.f32.xlu1 %v1307_v61 }
 0x129   : > { %1329 = vadd.xlane.f32.xlu0 %v1328_v25 }
 0x12b   : > { %1353 = vadd.xlane.f32.xlu1 %v1352_v37 }
 0x12d   : > { %1332 = vadd.xlane.f32.xlu0 %v1331_v18 }
 0x12f   : > { %1356 = vadd.xlane.f32.xlu1 %v1355_v50 }
 0x131   : > { %1287 = vadd.xlane.f32.xlu0 %v1286_v3 }
 0x133   : > { %1311 = vadd.xlane.f32.xlu1 %v1310_v6 }
 0x135   : > { %1335 = vadd.xlane.f32.xlu0 %v1334_v58 }
 0x137   : > { %1359 = vadd.xlane.f32.xlu1 %v1358_v59 }
 0x186   : > { %v1267_v39 = vpop.xlane.xlu0 %1266 }
 0x187   : > { %v1406_v32 = vrot.slane %v1267_v39, %v3499_v9 }
 0x188   : > { %v1270_v0 = vpop.xlane.xlu1 %1269 }
 0x189   : > { %v1410_v37 = vrot.slane %v1270_v0, %v3499_v9 }
 0x18a   : > { %v1291_v2 = vpop.xlane.xlu0 %1290 }
 0x18b   : > { %v1532_v43 = vsel %vm1531_vm2, %v1410_v37, %v1406_v32  ;;  %v1438_v18 = vrot.slane %v1291_v2, %v3499_v9 }
 0x18c   : > { %v1294_v63 = vpop.xlane.xlu1 %1293 }
 0x18d   : > { %v1442_v38 = vrot.slane %v1294_v63, %v3499_v9 }
 0x18e   : > { %v1315_v10 = vpop.xlane.xlu0 %1314 }
 0x18f   : > { %v1470_v54 = vrot.slane %v1315_v10, %v3499_v9  ;;  %v1545_v3 = vsel %vm1531_vm2, %v1442_v38, %v1438_v18  ;;  %v1364_v38 = vld [vmem:[%s3543_s20 + $0x18] sm:$0xff] }
 0x190   : > { %v3502_v47 = vpop.xlane.xlu1 %1296  ;;  %vm1368_vm13 = vcmp.gt.f32.partialorder %v1364_v38, 0.5 }
 0x191   : > { %v1446_v51 = vrot.slane %v3502_v47, %v3499_v9  ;;  %v1361_v47 = vld [vmem:[%s3543_s20] sm:$0xff] }
 0x192   : > { %v1339_v11 = vpop.xlane.xlu0 %1338  ;;  %vm1365_vm9 = vcmp.gt.f32.partialorder %v1361_v47, 0.5 }
 0x193   : > { %v1502_v48 = vrot.slane %v1339_v11, %v3499_v9  ;;  %v1546_v63 = vsel %vm1533_vm3, %v1446_v51, %v1545_v3  ;;  %v2777_v3 = vld [vmem:[%s3083_s30] sm:$0xff]  }
 0x194   : > { %v1318_v12 = vpop.xlane.xlu1 %1317  ;;  %2690 = vmatprep.subr.bf16.mxu1 %v2777_v3 }
 0x195   : > { %v1474_v1 = vrot.slane %v1318_v12, %v3499_v9  ;;  %2691 = vmatpush3.bf16.msra.mxu1 %v2777_v3 }
 0x196   : > { %v1273_v15 = vpop.xlane.xlu0 %1272 }
 0x197   : > { %v1552_v14 = vsel %vm1531_vm2, %v1474_v1, %v1470_v54  ;;  %v1414_v41 = vrot.slane %v1273_v15, %v3499_v9 }
 0x198   : > { %v1342_v55 = vpop.xlane.xlu1 %1341 }
 0x199   : > { %v1506_v17 = vrot.slane %v1342_v55, %v3499_v9  ;;  %v1534_v4 = vsel %vm1533_vm3, %v1414_v41, %v1532_v43  ;;  %v1363_v41 = vld [vmem:[%s3543_s20 + $0x10] sm:$0xff] }
 0x19a   : > { %v1321_v7 = vpop.xlane.xlu0 %1320  ;;  %vm1367_vm12 = vcmp.gt.f32.partialorder %v1363_v41, 0.5 }
 0x19b   : > { %v1559_v30 = vsel %vm1531_vm2, %v1506_v17, %v1502_v48  ;;  %v1478_v44 = vrot.slane %v1321_v7, %v3499_v9  ;;  %v1362_v7 = vld [vmem:[%s3543_s20 + $0x8] sm:$0xff]  ;;  %s3984_s20 = scalar_lea.hbm %s4044_s8, %s2610_s16 }
 0x19c   : > { %v1345_v20 = vpop.xlane.xlu1 %1344  ;;  %vm1366_vm11 = vcmp.gt.f32.partialorder %v1362_v7, 0.5 }
 0x19d   : > { %v1553_v28 = vsel %vm1533_vm3, %v1478_v44, %v1552_v14  ;;  %v1510_v22 = vrot.slane %v1345_v20, %v3499_v9 }
 0x19e   : > { %v1279_v45 = vpop.xlane.xlu0 %1278 }
 0x19f   : > { %v1560_v23 = vsel %vm1533_vm3, %v1510_v22, %v1559_v30  ;;  %v1422_v58 = vrot.slane %v1279_v45, %v3499_v9 }
 0x1a0   : > { %v3513_v57 = vpop.xlane.xlu1 %1302 }
 0x1a1   : > { %v1454_v15 = vrot.slane %v3513_v57, %v3499_v9 }
 0x1a2   : > { %v1327_v33 = vpop.xlane.xlu0 %1326 }
 0x1a3   : > { %v1486_v8 = vrot.slane %v1327_v33, %v3499_v9 }
 0x1a4   : > { %v1351_v56 = vpop.xlane.xlu1 %1350 }
 0x1a5   : > { %v1518_v19 = vrot.slane %v1351_v56, %v3499_v9 }
 0x1a6   : > { %v1276_v24 = vpop.xlane.xlu0 %1275 }
 0x1a7   : > { %v1418_v49 = vrot.slane %v1276_v24, %v3499_v9 }
 0x1a8   : > { %v1300_v61 = vpop.xlane.xlu1 %1299 }
 0x1a9   : > { %v1450_v5 = vrot.slane %v1300_v61, %v3499_v9  ;;  %v1536_v39 = vsel %vm1535_vm4, %v1418_v49, %v1534_v4 }
 0x1aa   : > { %v1324_v62 = vpop.xlane.xlu0 %1323  ;;  %v1538_v14 = vsel %vm1537_vm5, %v1422_v58, %v1536_v39 }
 0x1ab   : > { %v1482_v52 = vrot.slane %v1324_v62, %v3499_v9  ;;  %v1547_v11 = vsel %vm1535_vm4, %v1450_v5, %v1546_v63 }
 0x1ac   : > { %v1348_v35 = vpop.xlane.xlu1 %1347 }
 0x1ad   : > { %v1554_v13 = vsel %vm1535_vm4, %v1482_v52, %v1553_v28  ;;  %v1514_v60 = vrot.slane %v1348_v35, %v3499_v9  ;;  %v1548_v28 = vsel %vm1537_vm5, %v1454_v15, %v1547_v11 }
 0x1ae   : > { %v1282_v25 = vpop.xlane.xlu0 %1281  ;;  %v1555_v16 = vsel %vm1537_vm5, %v1486_v8, %v1554_v13 }
 0x1af   : > { %v1561_v29 = vsel %vm1535_vm4, %v1514_v60, %v1560_v23  ;;  %v1426_v0 = vrot.slane %v1282_v25, %v3499_v9 }
 0x1b0   : > { %v1306_v31 = vpop.xlane.xlu1 %1305  ;;  %v1562_v21 = vsel %vm1537_vm5, %v1518_v19, %v1561_v29  ;;  %v514_v29 = vld [vmem:[%s445_s26] sm:$0x1]  ;;  %s2945_s26 = smov [#allocation4]  }
 0x1b1   : > { %v1458_v48 = vrot.slane %v1306_v31, %v3499_v9  ;;  %v1540_v30 = vsel %vm1539_vm6, %v1426_v0, %v1538_v14  ;;  %v721_v31 = vsub.f32 1.0, %v514_v29  ;;  %v2781_v29 = vld [vmem:[%s3083_s30 + $0x20] sm:$0xff]   ;;  %s2865_s23 = sshll.u32 %s2945_s26, 4  ;;  %s2866_s23 = int_to_ptr.vmem [resolvable:$false] %s2865_s23 }
 0x1b2   : > { %v1285_v36 = vpop.xlane.xlu0 %1284  ;;  %p2868_p6 = scmp.lt.s32.totalorder %s3977_s15, %s2866_s23 }
 0x1b3   : > { %v1430_v10 = vrot.slane %v1285_v36, %v3499_v9  ;;  %v1549_v23 = vsel %vm1539_vm6, %v1458_v48, %v1548_v28 }
 0x1b4   : > { %v1309_v42 = vpop.xlane.xlu1 %1308 }
 0x1b5   : > { %v1462_v55 = vrot.slane %v1309_v42, %v3499_v9  ;;  %v1542_v45 = vsel %vm1541_vm7, %v1430_v10, %v1540_v30 }
 0x1b6   : > { %v1330_v46 = vpop.xlane.xlu0 %1329 }
 0x1b7   : > { %v1490_v50 = vrot.slane %v1330_v46, %v3499_v9  ;;  %v1550_v19 = vsel %vm1541_vm7, %v1462_v55, %v1549_v23 }
 0x1b8   : > { %v1354_v53 = vpop.xlane.xlu1 %1353 }
 0x1b9   : > { %v1556_v6 = vsel %vm1539_vm6, %v1490_v50, %v1555_v16  ;;  %v1522_v34 = vrot.slane %v1354_v53, %v3499_v9 }
 0x1ba   : > { %v1333_v59 = vpop.xlane.xlu0 %1332 }
 0x1bb   : > { %v1563_v40 = vsel %vm1539_vm6, %v1522_v34, %v1562_v21  ;;  %v1494_v2 = vrot.slane %v1333_v59, %v3499_v9  ;;  %v722_v21 = vmul.f32 -3.4028235e+38, %v721_v31  ;;  %v2782_v31 = vld [vmem:[%s3083_s30 + $0x28] sm:$0xff]  }
 0x1bc   : > { %v1357_v54 = vpop.xlane.xlu1 %1356 }
 0x1bd   : > { %v1526_v12 = vrot.slane %v1357_v54, %v3499_v9  ;;  %v1557_v1 = vsel %vm1541_vm7, %v1494_v2, %v1556_v6  ;;  %v727_v32 = vrot.slane %v722_v21, %v3231_v27  ;;  %v2783_v21 = vld [vmem:[%s3083_s30 + $0x30] sm:$0xff]  }
 0x1be   : > { %v1288_v17 = vpop.xlane.xlu0 %1287 }
 0x1bf   : > { %v1434_v44 = vrot.slane %v1288_v17, %v3499_v9  ;;  %v1564_v20 = vsel %vm1541_vm7, %v1526_v12, %v1563_v40 }
 0x1c0   : > { %v1312_v22 = vpop.xlane.xlu1 %1311 }
 0x1c1   : > { %v1466_v57 = vrot.slane %v1312_v22, %v3499_v9  ;;  %v1544_v33 = vsel %vm1543_vm8, %v1434_v44, %v1542_v45 }
 0x1c2   : > { %v1336_v8 = vpop.xlane.xlu0 %1335  ;;  %v3570_v56 = vsel %vm1365_vm9, %v1544_v33, -3.4028235e+38 }
 0x1c3   : > { %v1498_v24 = vrot.slane %v1336_v8, %v3499_v9  ;;  %v1583_v61 = vsel %vm1582_vm10, %v3570_v56, -inf  ;;  %v1551_v62 = vsel %vm1543_vm8, %v1466_v57, %v1550_v19 }
 0x1c4   : > { %v1360_v52 = vpop.xlane.xlu1 %1359  ;;  %1584 = vmax.xlane.f32.xlu0 %v1583_v61  ;;  %v1571_v35 = vsel %vm1366_vm11, %v1551_v62, -3.4028235e+38 }
 0x1c5   : > { %v1530_v13 = vrot.slane %v1360_v52, %v3499_v9  ;;  %v1586_v60 = vsel %vm1582_vm10, %v1571_v35, -inf  ;;  %v1558_v25 = vsel %vm1543_vm8, %v1498_v24, %v1557_v1 }
 0x1c6   : > { %1587 = vmax.xlane.f32.xlu1 %v1586_v60  ;;  %v1572_v50 = vsel %vm1367_vm12, %v1558_v25, -3.4028235e+38  ;;  %v2778_v60 = vld [vmem:[%s3083_s30 + $0x8] sm:$0xff]   ;;  %v2779_v25 = vld [vmem:[%s3083_s30 + $0x10] sm:$0xff]  }
 0x1c7   : > { %v1565_v16 = vsel %vm1543_vm8, %v1530_v13, %v1564_v20  ;;  %v1589_v4 = vsel %vm1582_vm10, %v1572_v50, -inf  ;;  %2692 = vmatprep.subr.bf16.mxu1 %v2778_v60 }
 0x1c8   : > { %v1573_v51 = vsel %vm1368_vm13, %v1565_v16, -3.4028235e+38  ;;  %2693 = vmatpush3.bf16.msra.mxu1 %v2778_v60  ;;  %v2780_v16 = vld [vmem:[%s3083_s30 + $0x18] sm:$0xff]  }
 0x1c9   : > { %v1592_v53 = vsel %vm1582_vm10, %v1573_v51, -inf  ;;  %2694 = vmatprep.subr.bf16.mxu1 %v2779_v25 }
 0x1cc   : > { %2695 = vmatpush3.bf16.msra.mxu1 %v2779_v25 }
 0x1cd   : > { %2696 = vmatprep.subr.bf16.mxu1 %v2780_v16 }
 0x1d0   : > { %2697 = vmatpush3.bf16.msra.mxu1 %v2780_v16 }
 0x1d1   : > { %2698 = vmatprep.subr.bf16.mxu1 %v2781_v29 }
 0x1d4   : > { %2699 = vmatpush3.bf16.msra.mxu1 %v2781_v29  ;;  %v1792_v29 = vsub.s32 7, %v3209_v26 }
 0x1d5   : > { %2700 = vmatprep.subr.bf16.mxu1 %v2782_v31 }
 0x1d8   : > { %2701 = vmatpush3.bf16.msra.mxu1 %v2782_v31 }
 0x1d9   : > { %2702 = vmatprep.subr.bf16.mxu1 %v2783_v21 }
 0x1dc   : > { %2703 = vmatpush3.bf16.msra.mxu1 %v2783_v21 }
 0x1e7   : > { %v2688_v37 = vpop.f32.mrb[0].mxu0 }
 0x1e8   : > { %v802_v36 = vadd.f32 %v2688_v37, %v727_v32  ;;  %v793_v9 = vpop.f32.mrb[1].mxu0 }
 0x1e9   : > { %v2689_v42 = vpop.f32.mrb[2].mxu0  ;;  %v794_v46 = vadd.f32 %v793_v9, %v727_v32 }
 0x1ea   : > { %v805_v43 = vadd.f32 %v2689_v42, %v727_v32  ;;  %v796_v18 = vpop.f32.mrb[3].mxu0  ;;  %1578 = vmax.xlane.f32.xlu0 %v802_v36 }
 0x1eb   : > { %v797_v49 = vadd.f32 %v796_v18, %v727_v32  ;;  %v2784_v32 = vld [vmem:[%s3083_s30 + $0x38] sm:$0xff]   ;;  %s2867_s30 = scalar_lea.vmem %s2866_s23, 1024 }
 0x1ec   : > { %1580 = vmax.xlane.f32.xlu1 %v805_v43  ;;  %2704 = vmatprep.subr.bf16.mxu1 %v2784_v32  ;;  %p2869_p7 = scmp.lt.s32.totalorder %s2867_s30, %s2861_s25 }
 0x1ed   : > { %2705 = vmatpush3.bf16.msra.mxu1 %v2784_v32 }
 0x1ee   : > { %1574 = vmax.xlane.f32.xlu0 %v794_v46  ;;  %p2870_p8 = por %p2869_p7, %p2868_p6 }
 0x1f0   : > { %1576 = vmax.xlane.f32.xlu1 %v797_v49  ;;  %p2871_p10 = pnand %p2870_p8, %p2864_p5 }
 0x1f2   : > { %1590 = vmax.xlane.f32.xlu0 %v1589_v4 }
 0x1f4   : > { %1593 = vmax.xlane.f32.xlu1 %v1592_v53 }
 0x251   : > { %v1585_v5 = vpop.xlane.xlu0 %1584 }
 0x253   : > { %v1588_v6 = vpop.xlane.xlu1 %1587 }
 0x277   : > { %v1579_v34 = vpop.xlane.xlu0 %1578 }
 0x279   : > { %v1581_v58 = vpop.xlane.xlu1 %1580 }
 0x27b   : > { %v1575_v59 = vpop.xlane.xlu0 %1574 }
 0x27c   : > { %v1595_v0 = vmax.f32 %v1575_v59, %v1585_v5  ;;  %v1750_v59 = vsub.s32 1, %v3209_v26 }
 0x27d   : > { %v1577_v39 = vpop.xlane.xlu1 %1576 }
 0x27e   : > { %v1596_v2 = vmax.f32 %v1577_v39, %v1588_v6  ;;  %v1599_v47 = vsub.f32 %v794_v46, %v1595_v0  ;;  %v1611_v48 = vsub.f32 %v3570_v56, %v1595_v0 }
 0x27f   : > { %v1591_v40 = vpop.xlane.xlu0 %1590 }
 0x280   : > { %v1597_v63 = vmax.f32 %v1579_v34, %v1591_v40  ;;  %v1600_v1 = vsub.f32 %v797_v49, %v1596_v2  ;;  %v1612_v14 = vsub.f32 %v1571_v35, %v1596_v2  ;;  %v1603_v17 = vmul.f32 1.442695, %v1599_v47 }
 0x281   : > { %v1594_v10 = vpop.xlane.xlu1 %1593  ;;  %v1615_v7 = vmul.f32 1.442695, %v1611_v48  ;;  %v1757_v47 = vsub.s32 2, %v3209_v26 }
 0x282   : > { %v1598_v54 = vmax.f32 %v1581_v58, %v1594_v10  ;;  %v1601_v11 = vsub.f32 %v802_v36, %v1597_v63  ;;  %v1613_v30 = vsub.f32 %v1572_v50, %v1597_v63  ;;  %v1605_v44 = vmul.f32 1.442695, %v1600_v1 }
 0x283   : > { %v1617_v20 = vmul.f32 1.442695, %v1612_v14  ;;  %v1764_v1 = vsub.s32 3, %v3209_v26 }
 0x284   : > { %v1602_v12 = vsub.f32 %v805_v43, %v1598_v54  ;;  %v1607_v15 = vmul.f32 1.442695, %v1601_v11  ;;  %v1614_v28 = vsub.f32 %v1573_v51, %v1598_v54  ;;  %v1619_v22 = vmul.f32 1.442695, %v1613_v30 }
 0x285   : > { %v1778_v30 = vsub.s32 5, %v3209_v26 }
 0x286   : > { %v1609_v55 = vmul.f32 1.442695, %v1602_v12  ;;  %2825 = vpow2.f32 %v1607_v15  ;;  %v1621_v45 = vmul.f32 1.442695, %v1614_v28  ;;  %v1785_v28 = vsub.s32 6, %v3209_v26 }
 0x288   : > { %2827 = vpow2.f32 %v1609_v55  ;;  %v1771_v55 = vsub.s32 4, %v3209_v26 }
 0x289   : > { %2829 = vpow2.f32 %v1603_v17 }
 0x28a   : > { %2831 = vpow2.f32 %v1615_v7 }
 0x28b   : > { %2833 = vpow2.f32 %v1605_v44 }
 0x28c   : > { %2835 = vpow2.f32 %v1617_v20 }
 0x28d   : > { %2837 = vpow2.f32 %v1619_v22 }
 0x28e   : > { %2839 = vpow2.f32 %v1621_v45 }
 0x290   : > { %v3592_v23 = vpop.eup %2825 }
 0x291   : > { %1627 = vadd.xlane.f32.xlu0 %v3592_v23 }
 0x292   : > { %v3595_v57 = vpop.eup %2827 }
 0x293   : > { %1629 = vadd.xlane.f32.xlu1 %v3595_v57  ;;  %v2830_v33 = vpop.eup %2829 }
 0x294   : > { %v2832_v8 = vpop.eup %2831 }
 0x295   : > { %1623 = vadd.xlane.f32.xlu0 %v2830_v33  ;;  %v2834_v56 = vpop.eup %2833  ;;  %v1631_v24 = vsel %vm1582_vm10, %v2832_v8, 0.0 }
 0x296   : > { %v3598_v19 = vpop.eup %2835 }
 0x297   : > { %1625 = vadd.xlane.f32.xlu1 %v2834_v56  ;;  %v2838_v61 = vpop.eup %2837  ;;  %v1634_v62 = vsel %vm1582_vm10, %v3598_v19, 0.0 }
 0x298   : > { %v2840_v52 = vpop.eup %2839  ;;  %v1637_v35 = vsel %vm1582_vm10, %v2838_v61, 0.0 }
 0x299   : > { %1632 = vadd.xlane.f32.xlu0 %v1631_v24  ;;  %v1640_v13 = vsel %vm1582_vm10, %v2840_v52, 0.0 }
 0x29b   : > { %1635 = vadd.xlane.f32.xlu1 %v1634_v62 }
 0x29d   : > { %1638 = vadd.xlane.f32.xlu0 %v1637_v35 }
 0x29f   : > { %1641 = vadd.xlane.f32.xlu1 %v1640_v13 }
 0x31e   : > { %v1628_v37 = vpop.xlane.xlu0 %1627 }
 0x320   : > { %v1630_v36 = vpop.xlane.xlu1 %1629 }
 0x322   : > { %v1624_v9 = vpop.xlane.xlu0 %1623 }
 0x324   : > { %v1626_v41 = vpop.xlane.xlu1 %1625 }
 0x326   : > { %v1633_v42 = vpop.xlane.xlu0 %1632 }
 0x327   : > { %v1643_v43 = vadd.f32 %v1633_v42, %v1624_v9 }
 0x328   : > { %v1636_v18 = vpop.xlane.xlu1 %1635 }
 0x329   : > { %2841 = vrcp.f32 %v1643_v43  ;;  %v1644_v38 = vadd.f32 %v1636_v18, %v1626_v41 }
 0x32a   : > { %v1639_v46 = vpop.xlane.xlu0 %1638 }
 0x32b   : > { %2843 = vrcp.f32 %v1644_v38  ;;  %v1645_v49 = vadd.f32 %v1639_v46, %v1628_v37  ;;  %v1690_v38 = vld [vmem:[%s3660_s27 + $0x22] sm:$0x3]  ;;  %v1689_v46 = vld [vmem:[%s3660_s27 + $0x20] sm:$0x3] }
 0x32c   : > { %v1642_v50 = vpop.xlane.xlu1 %1641 }
 0x32d   : > { %2845 = vrcp.f32 %v1645_v49  ;;  %v1646_v51 = vadd.f32 %v1642_v50, %v1630_v36  ;;  %v1722_v49 = vunpack.c.l.bf16 %v1690_v38  ;;  %v1721_v50 = vunpack.c.l.bf16 %v1689_v46  ;;  %v3748_v38 = vld [vmem:[%s3660_s27 + $0xa] sm:$0x3]  ;;  %v3751_v46 = vld [vmem:[%s3660_s27 + $0x16] sm:$0x3] }
 0x32f   : > { %2847 = vrcp.f32 %v1646_v51 }
 0x333   : > { %v2842_v4 = vpop.eup %2841 }
 0x334   : > { %v1651_v3 = vmul.f32 %v2842_v4, %v2830_v33  ;;  %v3615_v0 = vmul.f32 %v2842_v4, %v2832_v8 }
 0x335   : > { %v2844_v53 = vpop.eup %2843 }
 0x336   : > { %v1652_v5 = vmul.f32 %v2844_v53, %v2834_v56  ;;  %v1751_v48 = vrot.slane %v3615_v0, %v1750_v59  ;;  %v1738_v33 = vmul.f32 %v2844_v53, %v3598_v19  ;;  %v1758_v56 = vrot.slane %v3615_v0, %v1757_v47  ;;  %v1674_v53 = vld [vmem:[%s3660_s27 + $0x2] sm:$0x3] }
 0x337   : > { %v2846_v6 = vpop.eup %2845  ;;  %v1779_v19 = vrot.slane %v3615_v0, %v1778_v30  ;;  %v1786_v60 = vrot.slane %v3615_v0, %v1785_v28  ;;  %v1793_v21 = vrot.slane %v3615_v0, %v1792_v29 }
 0x338   : > { %v3612_v34 = vmul.f32 %v2846_v6, %v2838_v61  ;;  %v1655_v58 = vpack.c.bf16 %v1652_v5, %v1651_v3  ;;  %v1653_v63 = vmul.f32 %v2846_v6, %v3592_v23  ;;  %v1800_v24 = vrot.slane %v1738_v33, %v3231_v27 }
 0x339   : > { %v2848_v39 = vpop.eup %2847  ;;  %v1765_v61 = vrot.slane %v3615_v0, %v1764_v1  ;;  %v1807_v62 = vrot.slane %v1738_v33, %v1750_v59  ;;  %v1814_v35 = vrot.slane %v1738_v33, %v1757_v47  ;;  %v1821_v13 = vrot.slane %v1738_v33, %v1764_v1 }
 0x33a   : > { %2706 = vmatprep.mubr.bf16.mxu1 %v1655_v58  ;;  %v1863_v40 = vrot.slane %v3612_v34, %v1750_v59  ;;  %v1856_v2 = vrot.slane %v3612_v34, %v3231_v27  ;;  %v1654_v10 = vmul.f32 %v2848_v39, %v3595_v57  ;;  %v3623_v11 = vmul.f32 %v2848_v39, %v2840_v52 }
 0x33b   : > { %v1870_v12 = vrot.slane %v3612_v34, %v1757_v47  ;;  %v1877_v14 = vrot.slane %v3612_v34, %v1764_v1  ;;  %v1884_v7 = vrot.slane %v3612_v34, %v1771_v55  ;;  %v1891_v20 = vrot.slane %v3612_v34, %v1778_v30 }
 0x33c   : > { %1865 = vbcast.lane.b32.xlu1 %v1863_v40, 256  ;;  %1858 = vbcast.lane.b32.xlu0 %v1856_v2, 256  ;;  %v1656_v54 = vpack.c.bf16 %v1654_v10, %v1653_v63  ;;  %v1919_v15 = vrot.slane %v3623_v11, %v1750_v59  ;;  %v1926_v17 = vrot.slane %v3623_v11, %v1757_v47  ;;  %v1706_v58 = vunpack.c.l.bf16 %v1674_v53  ;;  %v1691_v59 = vld [vmem:[%s3660_s27 + $0x24] sm:$0x3]  ;;  %v1692_v47 = vld [vmem:[%s3660_s27 + $0x26] sm:$0x3] }
 0x33d   : > { %v1933_v44 = vrot.slane %v3623_v11, %v1764_v1  ;;  %v1940_v22 = vrot.slane %v3623_v11, %v1771_v55  ;;  %v1898_v45 = vrot.slane %v3612_v34, %v1785_v28  ;;  %v1947_v23 = vrot.slane %v3623_v11, %v1778_v30 }
 0x33e   : > { %2707 = vmatmul.mubr.bf16.vlgmr.msra.gmra.mrb[0].mxu1 %v1656_v54  ;;  %v1744_v57 = vrot.slane %v3615_v0, %v3231_v27  ;;  %v1954_v8 = vrot.slane %v3623_v11, %v1785_v28  ;;  %v1772_v52 = vrot.slane %v3615_v0, %v1771_v55  ;;  %v1828_v25 = vrot.slane %v1738_v33, %v1771_v55  ;;  %v1698_v54 = vld [vmem:[%s3660_s27 + $0x32] sm:$0x3]  ;;  %v3695_v55 = vld [vmem:[%s3660_s27 + $0x38] sm:$0x3] }
 0x33f   : > { %v1912_v16 = vrot.slane %v3623_v11, %v3231_v27  ;;  %v1835_v31 = vrot.slane %v1738_v33, %v1778_v30  ;;  %v1842_v32 = vrot.slane %v1738_v33, %v1785_v28  ;;  %v1905_v37 = vrot.slane %v3612_v34, %v1792_v29 }
 0x340   : > { %1753 = vbcast.lane.b32.xlu1 %v1751_v48, 256  ;;  %1872 = vbcast.lane.b32.xlu0 %v1870_v12, 256  ;;  %v1849_v36 = vrot.slane %v1738_v33, %v1792_v29  ;;  %v1961_v9 = vrot.slane %v3623_v11, %v1792_v29  ;;  %v1723_v10 = vunpack.c.l.bf16 %v1691_v59  ;;  %v1699_v11 = vld [vmem:[%s3660_s27 + $0x34] sm:$0x3]  ;;  %v1693_v48 = vld [vmem:[%s3660_s27 + $0x28] sm:$0x3] }
 0x341   : > { %v1731_v33 = vunpack.c.l.bf16 %v1699_v11  ;;  %v3764_v59 = vld [vmem:[%s3660_s27 + $0x30] sm:$0x3] }
 0x344   : > { %1921 = vbcast.lane.b32.xlu1 %v1919_v15, 256  ;;  %1879 = vbcast.lane.b32.xlu0 %v1877_v14, 256  ;;  %v3689_v15 = vld [vmem:[%s3660_s27 + $0x36] sm:$0x3]  ;;  %v3692_v14 = vld [vmem:[%s3660_s27 + $0x2a] sm:$0x3] }
 0x348   : > { %1928 = vbcast.lane.b32.xlu1 %v1926_v17, 256  ;;  %1886 = vbcast.lane.b32.xlu0 %v1884_v7, 256  ;;  %v3698_v17 = vld [vmem:[%s3660_s27 + $0x2c] sm:$0x3]  ;;  %v3701_v7 = vld [vmem:[%s3660_s27 + $0x3a] sm:$0x3] }
 0x34c   : > { %1935 = vbcast.lane.b32.xlu1 %v1933_v44, 256  ;;  %1893 = vbcast.lane.b32.xlu0 %v1891_v20, 256 }
 0x350   : > { %1942 = vbcast.lane.b32.xlu1 %v1940_v22, 256  ;;  %1900 = vbcast.lane.b32.xlu0 %v1898_v45, 256  ;;  %v1730_v22 = vunpack.c.l.bf16 %v1698_v54  ;;  %v1724_v45 = vunpack.c.l.bf16 %v1692_v47  ;;  %v3769_v54 = vld [vmem:[%s3660_s27 + $0x1a] sm:$0x3] }
 0x354   : > { %1949 = vbcast.lane.b32.xlu1 %v1947_v23, 256  ;;  %1746 = vbcast.lane.b32.xlu0 %v1744_v57, 256  ;;  %v3709_v23 = vld [vmem:[%s3660_s27] sm:$0x3]  ;;  %v3712_v57 = vld [vmem:[%s3660_s27 + $0x3c] sm:$0x3] }
 0x358   : > { %1956 = vbcast.lane.b32.xlu1 %v1954_v8, 256  ;;  %1760 = vbcast.lane.b32.xlu0 %v1758_v56, 256  ;;  %v1725_v8 = vunpack.c.l.bf16 %v1693_v48  ;;  %v1732_v56 = vunpack.c.l.bf16 %v3689_v15 }
 0x35c   : > { %1802 = vbcast.lane.b32.xlu1 %v1800_v24, 256  ;;  %1767 = vbcast.lane.b32.xlu0 %v1765_v61, 256  ;;  %v1726_v24 = vunpack.c.l.bf16 %v3692_v14  ;;  %v3717_v61 = vld [vmem:[%s3660_s27 + $0x4] sm:$0x3] }
 0x360   : > { %1809 = vbcast.lane.b32.xlu1 %v1807_v62, 256  ;;  %1774 = vbcast.lane.b32.xlu0 %v1772_v52, 256  ;;  %v3720_v62 = vld [vmem:[%s3660_s27 + $0x10] sm:$0x3]  ;;  %v3723_v52 = vld [vmem:[%s3660_s27 + $0x6] sm:$0x3] }
 0x364   : > { %1816 = vbcast.lane.b32.xlu1 %v1814_v35, 256  ;;  %1781 = vbcast.lane.b32.xlu0 %v1779_v19, 256 }
 0x368   : > { %1823 = vbcast.lane.b32.xlu1 %v1821_v13, 256  ;;  %1788 = vbcast.lane.b32.xlu0 %v1786_v60, 256  ;;  %v1733_v13 = vunpack.c.l.bf16 %v3695_v55  ;;  %v1727_v60 = vunpack.c.l.bf16 %v3698_v17 }
 0x36c   : > { %1830 = vbcast.lane.b32.xlu1 %v1828_v25, 256  ;;  %1914 = vbcast.lane.b32.xlu0 %v1912_v16, 256  ;;  %v3728_v25 = vld [vmem:[%s3660_s27 + $0x12] sm:$0x3]  ;;  %v3731_v16 = vld [vmem:[%s3660_s27 + $0x8] sm:$0x3] }
 0x370   : > { %1837 = vbcast.lane.b32.xlu1 %v1835_v31, 256  ;;  %1795 = vbcast.lane.b32.xlu0 %v1793_v21, 256  ;;  %v1734_v31 = vunpack.c.l.bf16 %v3701_v7  ;;  %v1705_v21 = vunpack.c.l.bf16 %v3709_v23  ;;  %v3800_v7 = vld [vmem:[%s3660_s27 + $0x2e] sm:$0x3] }
 0x374   : > { %1844 = vbcast.lane.b32.xlu1 %v1842_v32, 256  ;;  %1907 = vbcast.lane.b32.xlu0 %v1905_v37, 256  ;;  %v1735_v32 = vunpack.c.l.bf16 %v3712_v57 }
 0x378   : > { %1851 = vbcast.lane.b32.xlu1 %v1849_v36, 256 }
 0x37c   : > { %1963 = vbcast.lane.b32.xlu1 %v1961_v9, 256  ;;  %v3741_v9 = vld [vmem:[%s3660_s27 + $0x14] sm:$0x3] }
 0x3ae   : > { %v1866_v27 = vpop.permute.xlu1 %1865  ;;  %v1859_v26 = vpop.permute.xlu0 %1858 }
 0x3af   : > { %v1982_v3 = vmul.f32 %v1866_v27, %v1722_v49  ;;  %v1981_v5 = vmul.f32 %v1859_v26, %v1721_v50  ;;  %v1707_v26 = vunpack.c.l.bf16 %v3717_v61 }
 0x3b1   : > { %v2116_v39 = vsel %vm1264_vm1, %v1982_v3, 0.0  ;;  %v2109_v0 = vsel %vm1264_vm1, %v1981_v5, 0.0  ;;  %v3758_v5 = vld [vmem:[%s3660_s27 + $0xc] sm:$0x3] }
 0x3b2   : > { %v1754_v41 = vpop.permute.xlu1 %1753  ;;  %v1873_v42 = vpop.permute.xlu0 %1872  ;;  %v2117_v12 = vrot.slane %v2116_v39, 4  ;;  %v2110_v1 = vrot.slane %v2109_v0, 4 }
 0x3b3   : > { %v1966_v63 = vmul.f32 %v1754_v41, %v1706_v58  ;;  %v1983_v28 = vmul.f32 %v1873_v42, %v1723_v10  ;;  %v3761_v58 = vld [vmem:[%s3660_s27 + $0x18] sm:$0x3] }
 0x3b4   : > { %v2118_v35 = vadd.f32 %v2117_v12, %v2116_v39  ;;  %v2111_v19 = vadd.f32 %v2110_v1, %v2109_v0 }
 0x3b5   : > { %v2004_v20 = vsel %vm1264_vm1, %v1966_v63, 0.0  ;;  %v2123_v27 = vsel %vm1264_vm1, %v1983_v28, 0.0 }
 0x3b6   : > { %v3662_v43 = vpop.permute.xlu1 %1921  ;;  %v3664_v18 = vpop.permute.xlu0 %1879  ;;  %v2005_v29 = vrot.slane %v2004_v20, 4  ;;  %v2119_v39 = vrot.slane %v2118_v35, 2  ;;  %v2112_v0 = vrot.slane %v2111_v19, 2  ;;  %v2124_v47 = vrot.slane %v2123_v27, 4 }
 0x3b7   : > { %v1990_v49 = vmul.f32 %v3662_v43, %v1730_v22  ;;  %v1984_v50 = vmul.f32 %v3664_v18, %v1724_v45  ;;  %v3772_v43 = vld [vmem:[%s3660_s27 + $0xe] sm:$0x3] }
 0x3b8   : > { %v2006_v18 = vadd.f32 %v2005_v29, %v2004_v20  ;;  %v2120_v28 = vadd.f32 %v2119_v39, %v2118_v35  ;;  %v2113_v22 = vadd.f32 %v2112_v0, %v2111_v19 }
 0x3b9   : > { %v2172_v55 = vsel %vm1264_vm1, %v1990_v49, 0.0  ;;  %v2130_v17 = vsel %vm1264_vm1, %v1984_v50, 0.0  ;;  %v3797_v50 = vld [vmem:[%s3660_s27 + $0x1c] sm:$0x3] }
 0x3ba   : > { %v3668_v51 = vpop.permute.xlu1 %1928  ;;  %v3670_v4 = vpop.permute.xlu0 %1886  ;;  %4049 = vst [vmem:[#allocation8_spill] sm:$0xff] %v3797_v50  ;;  %v2173_v35 = vrot.slane %v2172_v55, 4  ;;  %v2131_v19 = vrot.slane %v2130_v17, 4 }
 0x3bb   : > { %v1991_v63 = vmul.f32 %v3668_v51, %v1731_v33  ;;  %v1985_v10 = vmul.f32 %v3670_v4, %v1725_v8  ;;  %v2007_v33 = vrot.slane %v2006_v18, 2  ;;  %v2125_v8 = vadd.f32 %v2124_v47, %v2123_v27 }
 0x3bd   : > { %v2179_v45 = vsel %vm1264_vm1, %v1991_v63, 0.0  ;;  %v2137_v23 = vsel %vm1264_vm1, %v1985_v10, 0.0  ;;  %v2008_v20 = vadd.f32 %v2007_v33, %v2006_v18  ;;  %v2126_v15 = vrot.slane %v2125_v8, 2 }
 0x3be   : > { %v3673_v6 = vpop.permute.xlu1 %1935  ;;  %v3675_v34 = vpop.permute.xlu0 %1893  ;;  %v2180_v27 = vrot.slane %v2179_v45, 4  ;;  %v2138_v63 = vrot.slane %v2137_v23, 4 }
 0x3bf   : > { %v1992_v29 = vmul.f32 %v3673_v6, %v1732_v56  ;;  %v1986_v4 = vmul.f32 %v3675_v34, %v1726_v24  ;;  %v2121_v56 = vrot.slane %v2120_v28, 1  ;;  %v2114_v24 = vrot.slane %v2113_v22, 1 }
 0x3c0   : > { %v2181_v10 = vadd.f32 %v2180_v27, %v2179_v45  ;;  %v2139_v47 = vadd.f32 %v2138_v63, %v2137_v23  ;;  %v2127_v45 = vadd.f32 %v2126_v15, %v2125_v8  ;;  %v2009_v3 = vrot.slane %v2008_v20, 1 }
 0x3c1   : > { %v2186_v1 = vsel %vm1264_vm1, %v1992_v29, 0.0 }
 0x3c2   : > { %v3680_v40 = vpop.permute.xlu1 %1942  ;;  %v3682_v2 = vpop.permute.xlu0 %1900  ;;  %v2182_v53 = vrot.slane %v2181_v10, 2  ;;  %v2128_v42 = vrot.slane %v2127_v45, 1 }
 0x3c3   : > { %v1993_v39 = vmul.f32 %v3680_v40, %v1733_v13  ;;  %v1987_v0 = vmul.f32 %v3682_v2, %v1727_v60  ;;  %v2144_v40 = vsel %vm1264_vm1, %v1986_v4, 0.0  ;;  %v3815_v60 = vld [vmem:[%s3660_s27 + $0x1e] sm:$0x3]  ;;  %v2187_v4 = vrot.slane %v2186_v1, 4 }
 0x3c4   : > { %4050 = vst [vmem:[#allocation9_spill] sm:$0xff] %v3815_v60  ;;  %v2145_v29 = vrot.slane %v2144_v40, 4 }
 0x3c6   : > { %v3703_v30 = vpop.permute.xlu1 %1949  ;;  %v3705_v44 = vpop.permute.xlu0 %1746 }
 0x3c7   : > { %v1994_v6 = vmul.f32 %v3703_v30, %v1734_v31  ;;  %v1965_v34 = vmul.f32 %v3705_v44, %v1705_v21  ;;  %v2174_v30 = vadd.f32 %v2173_v35, %v2172_v55  ;;  %v2132_v44 = vadd.f32 %v2131_v19, %v2130_v17 }
 0x3c8   : > { %v2193_v31 = vsel %vm1264_vm1, %v1993_v39, 0.0  ;;  %v2151_v21 = vsel %vm1264_vm1, %v1987_v0, 0.0  ;;  %v2122_v17 = vadd.f32 %v2121_v56, %v2120_v28  ;;  %v2115_v35 = vadd.f32 %v2114_v24, %v2113_v22 }
 0x3c9   : > { %v2200_v18 = vsel %vm1264_vm1, %v1994_v6, 0.0  ;;  %v1997_v33 = vsel %vm1264_vm1, %v1965_v34, 0.0  ;;  %v2194_v19 = vrot.slane %v2193_v31, 4  ;;  %v2152_v39 = vrot.slane %v2151_v21, 4  ;;  %v3830_v34 = vld [vmem:[%s3660_s27 + $0x3e] sm:$0x3] }
 0x3ca   : > { %v3736_v37 = vpop.permute.xlu1 %1956  ;;  %v3738_v36 = vpop.permute.xlu0 %1760  ;;  %v2175_v23 = vrot.slane %v2174_v30, 2  ;;  %v2201_v27 = vrot.slane %v2200_v18, 4  ;;  %v1998_v63 = vrot.slane %v1997_v33, 4  ;;  %v2133_v57 = vrot.slane %v2132_v44, 2 }
 0x3cb   : > { %v1995_v12 = vmul.f32 %v3736_v37, %v1735_v32  ;;  %v2140_v32 = vrot.slane %v2139_v47, 2  ;;  %v2188_v37 = vadd.f32 %v2187_v4, %v2186_v1  ;;  %v2146_v55 = vadd.f32 %v2145_v29, %v2144_v40 }
 0x3cc   : > { %v1967_v22 = vmul.f32 %v3738_v36, %v1707_v26  ;;  %v2315_v15 = vsel %vm1531_vm2, %v2122_v17, %v2115_v35  ;;  %v2195_v8 = vadd.f32 %v2194_v19, %v2193_v31  ;;  %v2153_v56 = vadd.f32 %v2152_v39, %v2151_v21 }
 0x3cd   : > { %v2207_v28 = vsel %vm1264_vm1, %v1995_v12, 0.0  ;;  %v1736_v14 = vunpack.c.l.bf16 %v3830_v34  ;;  %v2176_v41 = vadd.f32 %v2175_v23, %v2174_v30  ;;  %v2202_v60 = vadd.f32 %v2201_v27, %v2200_v18 }
 0x3ce   : > { %v3774_v11 = vpop.permute.xlu1 %1802  ;;  %v3776_v48 = vpop.permute.xlu0 %1767  ;;  %v1999_v50 = vadd.f32 %v1998_v63, %v1997_v33  ;;  %v3840_v1 = vadd.f32 %v2009_v3, %v2008_v20  ;;  %v2134_v40 = vadd.f32 %v2133_v57, %v2132_v44  ;;  %v2183_v12 = vadd.f32 %v2182_v53, %v2181_v10 }
 0x3cf   : > { %v2208_v4 = vrot.slane %v2207_v28, 4  ;;  %v2141_v61 = vadd.f32 %v2140_v32, %v2139_v47  ;;  %v2189_v29 = vrot.slane %v2188_v37, 2  ;;  %v2147_v36 = vrot.slane %v2146_v55, 2 }
 0x3d0   : > { %v2011_v26 = vsel %vm1264_vm1, %v1967_v22, 0.0  ;;  %v2196_v21 = vrot.slane %v2195_v8, 2  ;;  %v2154_v17 = vrot.slane %v2153_v56, 2  ;;  %v4051_v35 = vunpack.c.l.bf16 %v3720_v62 }
 0x3d1   : > { %v4052_v30 = vunpack.c.l.bf16 %v3723_v52  ;;  %v2129_v53 = vadd.f32 %v2128_v42, %v2127_v45  ;;  %v2177_v10 = vrot.slane %v2176_v41, 1  ;;  %v2203_v47 = vrot.slane %v2202_v60, 2 }
 0x3d2   : > { %v3792_v51 = vpop.permute.xlu1 %1809  ;;  %v3794_v49 = vpop.permute.xlu0 %1774  ;;  %v1973_v19 = vmul.f32 %v3774_v11, %v4051_v35  ;;  %v2000_v44 = vrot.slane %v1999_v50, 2  ;;  %v2135_v18 = vrot.slane %v2134_v40, 1  ;;  %v2209_v33 = vadd.f32 %v2208_v4, %v2207_v28 }
 0x3d3   : > { %v1968_v3 = vmul.f32 %v3776_v48, %v4052_v30  ;;  %v2012_v39 = vrot.slane %v2011_v26, 4  ;;  %v4053_v23 = vunpack.c.l.bf16 %v3764_v59  ;;  %v2184_v63 = vrot.slane %v2183_v12, 1 }
 0x3d4   : > { %v2142_v62 = vrot.slane %v2141_v61, 1  ;;  %v2190_v57 = vadd.f32 %v2189_v29, %v2188_v37  ;;  %v2148_v11 = vadd.f32 %v2147_v36, %v2146_v55  ;;  %v2197_v32 = vadd.f32 %v2196_v21, %v2195_v8 }
 0x3d5   : > { %v2155_v52 = vadd.f32 %v2154_v17, %v2153_v56  ;;  %v2053_v48 = vsel %vm1264_vm1, %v1973_v19, 0.0  ;;  %v2018_v22 = vsel %vm1264_vm1, %v1968_v3, 0.0  ;;  %v2316_v45 = vsel %vm1533_vm3, %v2129_v53, %v2315_v15 }
 0x3d6   : > { %v3810_v13 = vpop.permute.xlu1 %1816  ;;  %v3812_v2 = vpop.permute.xlu0 %1781  ;;  %v3856_v35 = vadd.f32 %v2177_v10, %v2176_v41  ;;  %v2204_v28 = vadd.f32 %v2203_v47, %v2202_v60  ;;  %v2001_v4 = vadd.f32 %v2000_v44, %v1999_v50  ;;  %v2136_v30 = vadd.f32 %v2135_v18, %v2134_v40 }
 0x3d7   : > { %v2210_v59 = vrot.slane %v2209_v33, 2  ;;  %v3859_v37 = vadd.f32 %v2184_v63, %v2183_v12  ;;  %v2191_v55 = vrot.slane %v2190_v57, 1  ;;  %v2054_v8 = vrot.slane %v2053_v48, 4 }
 0x3d8   : > { %v2019_v56 = vrot.slane %v2018_v22, 4  ;;  %v2143_v36 = vadd.f32 %v2142_v62, %v2141_v61  ;;  %v2149_v21 = vrot.slane %v2148_v11, 1  ;;  %v2198_v17 = vrot.slane %v2197_v32, 1 }
 0x3d9   : > { %v2156_v19 = vrot.slane %v2155_v52, 1  ;;  %v2205_v15 = vrot.slane %v2204_v28, 1  ;;  %v2002_v41 = vrot.slane %v2001_v4, 1  ;;  %v4054_v60 = vunpack.c.l.bf16 %v3728_v25 }
 0x3da   : > { %v3825_v0 = vpop.permute.xlu1 %1823  ;;  %v3827_v6 = vpop.permute.xlu0 %1788  ;;  %v2211_v3 = vadd.f32 %v2210_v59, %v2209_v33  ;;  %v4055_v12 = vunpack.c.l.bf16 %v3731_v16  ;;  %v4056_v47 = vunpack.c.l.bf16 %v3741_v9  ;;  %v3870_v44 = vadd.f32 %v2191_v55, %v2190_v57 }
 0x3db   : > { %v1974_v50 = vmul.f32 %v3792_v51, %v4054_v60  ;;  %v3872_v18 = vadd.f32 %v2054_v8, %v2053_v48  ;;  %v2317_v25 = vsel %vm1535_vm4, %v2136_v30, %v2316_v45  ;;  %v3877_v51 = vadd.f32 %v2149_v21, %v2148_v11  ;;  %v4066_v60 = vld [vmem:[#allocation9_spill] sm:$0xff] }
 0x3dc   : > { %v1969_v10 = vmul.f32 %v3794_v49, %v4055_v12  ;;  %v1975_v61 = vmul.f32 %v3810_v13, %v4056_v47  ;;  %v3879_v33 = vadd.f32 %v2198_v17, %v2197_v32  ;;  %v3884_v16 = vsel %vm1537_vm5, %v2143_v36, %v2317_v25 }
 0x3dd   : > { %v3886_v9 = vadd.f32 %v2205_v15, %v2204_v28  ;;  %v2003_v49 = vadd.f32 %v2002_v41, %v2001_v4  ;;  %v2060_v13 = vsel %vm1264_vm1, %v1974_v50, 0.0  ;;  %v2212_v57 = vrot.slane %v2211_v3, 1 }
 0x3de   : > { %v3837_v24 = vpop.permute.xlu1 %1830  ;;  %v1915_v31 = vpop.permute.xlu0 %1914  ;;  %v2025_v11 = vsel %vm1264_vm1, %v1969_v10, 0.0  ;;  %v2067_v32 = vsel %vm1264_vm1, %v1975_v61, 0.0  ;;  %v4057_v45 = vunpack.c.l.bf16 %v3748_v38  ;;  %v4058_v4 = vunpack.c.l.bf16 %v3751_v46 }
 0x3df   : > { %v1989_v27 = vmul.f32 %v1915_v31, %v4053_v23  ;;  %v2013_v31 = vadd.f32 %v2012_v39, %v2011_v26  ;;  %v3874_v39 = vadd.f32 %v2019_v56, %v2018_v22  ;;  %v4060_v8 = vunpack.c.l.bf16 %v3761_v58 }
 0x3e0   : > { %v1970_v28 = vmul.f32 %v3812_v2, %v4057_v45  ;;  %v1976_v30 = vmul.f32 %v3825_v0, %v4058_v4  ;;  %v4061_v36 = vunpack.c.l.bf16 %v3800_v7  ;;  %v2068_v38 = vrot.slane %v2067_v32, 4 }
 0x3e1   : > { %v2165_v23 = vsel %vm1264_vm1, %v1989_v27, 0.0  ;;  %v2014_v53 = vrot.slane %v2013_v31, 2  ;;  %v3881_v27 = vadd.f32 %v2156_v19, %v2155_v52  ;;  %v2056_v52 = vrot.slane %v3872_v18, 2 }
 0x3e2   : > { %v3849_v20 = vpop.permute.xlu1 %1837  ;;  %v1796_v29 = vpop.permute.xlu0 %1795  ;;  %v2166_v40 = vrot.slane %v2165_v23, 4  ;;  %v2021_v22 = vrot.slane %v3874_v39, 2  ;;  %v1977_v56 = vmul.f32 %v3837_v24, %v4060_v8  ;;  %v4062_v2 = vunpack.c.l.bf16 %v3769_v54 }
 0x3e3   : > { %v3889_v48 = vadd.f32 %v2014_v53, %v2013_v31  ;;  %v4059_v31 = vunpack.c.l.bf16 %v3758_v5  ;;  %v4063_v0 = vunpack.c.l.bf16 %v3772_v43  ;;  %v3916_v5 = vsel %vm1531_vm2, %v3840_v1, %v2003_v49 }
 0x3e4   : > { %v2167_v63 = vadd.f32 %v2166_v40, %v2165_v23  ;;  %v2061_v23 = vrot.slane %v2060_v13, 4  ;;  %v1978_v46 = vmul.f32 %v3849_v20, %v4062_v2  ;;  %v2026_v41 = vrot.slane %v2025_v11, 4 }
 0x3e5   : > { %v1971_v55 = vmul.f32 %v3827_v6, %v4059_v31  ;;  %v1972_v19 = vmul.f32 %v1796_v29, %v4063_v0  ;;  %v2016_v58 = vrot.slane %v3889_v48, 1  ;;  %v4064_v6 = vld [vmem:[#allocation8_spill] sm:$0xff]  ;;  %v2032_v54 = vsel %vm1264_vm1, %v1970_v28, 0.0 }
 0x3e6   : > { %v1845_v42 = vpop.permute.xlu1 %1844  ;;  %v1908_v62 = vpop.permute.xlu0 %1907  ;;  %v2168_v17 = vrot.slane %v2167_v63, 2  ;;  %v4065_v24 = vunpack.c.l.bf16 %v4064_v6  ;;  %v2074_v20 = vsel %vm1264_vm1, %v1976_v30, 0.0  ;;  %v4067_v43 = vunpack.c.l.bf16 %v4066_v60 }
 0x3e7   : > { %v1988_v21 = vmul.f32 %v1908_v62, %v4061_v36  ;;  %v2062_v50 = vadd.f32 %v2061_v23, %v2060_v13  ;;  %v2039_v1 = vsel %vm1264_vm1, %v1971_v55, 0.0  ;;  %v2081_v40 = vsel %vm1264_vm1, %v1977_v56, 0.0 }
 0x3e8   : > { %v1979_v15 = vmul.f32 %v1845_v42, %v4065_v24  ;;  %v2069_v12 = vadd.f32 %v2068_v38, %v2067_v32  ;;  %v2169_v42 = vadd.f32 %v2168_v17, %v2167_v63  ;;  %v2088_v34 = vsel %vm1264_vm1, %v1978_v46, 0.0 }
 0x3e9   : > { %v2158_v53 = vsel %vm1264_vm1, %v1988_v21, 0.0  ;;  %v2033_v10 = vrot.slane %v2032_v54, 4  ;;  %v2075_v47 = vrot.slane %v2074_v20, 4  ;;  %v2082_v49 = vrot.slane %v2081_v40, 4 }
 0x3ea   : > { %v1852_v26 = vpop.permute.xlu1 %1851  ;;  %v2095_v61 = vsel %vm1264_vm1, %v1979_v15, 0.0  ;;  %v2159_v13 = vrot.slane %v2158_v53, 4  ;;  %v3935_v45 = vadd.f32 %v2212_v57, %v2211_v3  ;;  %v2027_v28 = vadd.f32 %v2026_v41, %v2025_v11 }
 0x3eb   : > { %v1980_v29 = vmul.f32 %v1852_v26, %v4067_v43  ;;  %v2040_v26 = vrot.slane %v2039_v1, 4  ;;  %v2089_v32 = vrot.slane %v2088_v34, 4  ;;  %v2063_v4 = vrot.slane %v2062_v50, 2 }
 0x3ec   : > { %v2170_v30 = vrot.slane %v2169_v42, 1  ;;  %v2070_v31 = vrot.slane %v2069_v12, 2  ;;  %v2034_v55 = vadd.f32 %v2033_v10, %v2032_v54  ;;  %v2076_v8 = vadd.f32 %v2075_v47, %v2074_v20 }
 0x3ed   : > { %v2102_v62 = vsel %vm1264_vm1, %v1980_v29, 0.0  ;;  %v2057_v36 = vadd.f32 %v2056_v52, %v3872_v18  ;;  %v2041_v21 = vadd.f32 %v2040_v26, %v2039_v1  ;;  %v2083_v38 = vadd.f32 %v2082_v49, %v2081_v40 }
 0x3ee   : > { %v1964_v59 = vpop.permute.xlu1 %1963  ;;  %v2103_v56 = vrot.slane %v2102_v62, 4  ;;  %v2160_v17 = vadd.f32 %v2159_v13, %v2158_v53  ;;  %v2022_v2 = vadd.f32 %v2021_v22, %v3874_v39  ;;  %v2028_v3 = vrot.slane %v2027_v28, 2 }
 0x3ef   : > { %v1996_v7 = vmul.f32 %v1964_v59, %v1736_v14  ;;  %v2046_v14 = vsel %vm1264_vm1, %v1972_v19, 0.0  ;;  %v2096_v59 = vrot.slane %v2095_v61, 4  ;;  %v2090_v57 = vadd.f32 %v2089_v32, %v2088_v34 }
 0x3f0   : > { %v2047_v63 = vrot.slane %v2046_v14, 4  ;;  %v2064_v46 = vadd.f32 %v2063_v4, %v2062_v50  ;;  %v2171_v0 = vadd.f32 %v2170_v30, %v2169_v42  ;;  %v2071_v24 = vadd.f32 %v2070_v31, %v2069_v12 }
 0x3f1   : > { %v2214_v25 = vsel %vm1264_vm1, %v1996_v7, 0.0  ;;  %v2097_v19 = vadd.f32 %v2096_v59, %v2095_v61  ;;  %v2035_v15 = vrot.slane %v2034_v55, 2  ;;  %v2077_v7 = vrot.slane %v2076_v8, 2 }
 0x3f2   : > { %v2215_v23 = vrot.slane %v2214_v25, 4  ;;  %v2048_v11 = vadd.f32 %v2047_v63, %v2046_v14  ;;  %v2104_v41 = vadd.f32 %v2103_v56, %v2102_v62  ;;  %v2017_v54 = vadd.f32 %v2016_v58, %v3889_v48 }
 0x3f3   : > { %v2042_v20 = vrot.slane %v2041_v21, 2  ;;  %v2084_v18 = vrot.slane %v2083_v38, 2  ;;  %v2161_v52 = vrot.slane %v2160_v17, 2  ;;  %v2058_v60 = vrot.slane %v2057_v36, 1 }
 0x3f4   : > { %v2216_v6 = vadd.f32 %v2215_v23, %v2214_v25  ;;  %v2029_v43 = vadd.f32 %v2028_v3, %v2027_v28  ;;  %v2091_v29 = vrot.slane %v2090_v57, 2  ;;  %v2049_v39 = vrot.slane %v2048_v11, 2 }
 0x3f5   : > { %v2065_v22 = vrot.slane %v2064_v46, 1  ;;  %v2322_v50 = vsel %vm1531_vm2, %v3856_v35, %v2171_v0  ;;  %v2098_v1 = vrot.slane %v2097_v19, 2  ;;  %v2072_v53 = vrot.slane %v2071_v24, 1 }
 0x3f6   : > { %v2217_v40 = vrot.slane %v2216_v6, 2  ;;  %v2036_v12 = vadd.f32 %v2035_v15, %v2034_v55  ;;  %v2078_v42 = vadd.f32 %v2077_v7, %v2076_v8  ;;  %v2105_v34 = vrot.slane %v2104_v41, 2 }
 0x3f7   : > { %v2023_v14 = vrot.slane %v2022_v2, 1  ;;  %v2043_v10 = vadd.f32 %v2042_v20, %v2041_v21  ;;  %v2085_v48 = vadd.f32 %v2084_v18, %v2083_v38  ;;  %v2162_v58 = vadd.f32 %v2161_v52, %v2160_v17 }
 0x3f8   : > { %v2059_v47 = vadd.f32 %v2058_v60, %v2057_v36  ;;  %v2092_v61 = vadd.f32 %v2091_v29, %v2090_v57  ;;  %v2050_v25 = vadd.f32 %v2049_v39, %v2048_v11  ;;  %v2323_v26 = vsel %vm1533_vm3, %v3859_v37, %v2322_v50 }
 0x3f9   : > { %v2066_v49 = vadd.f32 %v2065_v22, %v2064_v46  ;;  %v2030_v13 = vrot.slane %v2029_v43, 1  ;;  %v2099_v35 = vadd.f32 %v2098_v1, %v2097_v19  ;;  %v2218_v62 = vadd.f32 %v2217_v40, %v2216_v6 }
 0x3fa   : > { %v2073_v28 = vadd.f32 %v2072_v53, %v2071_v24  ;;  %v2037_v32 = vrot.slane %v2036_v12, 1  ;;  %v2079_v63 = vrot.slane %v2078_v42, 1  ;;  %v2106_v4 = vadd.f32 %v2105_v34, %v2104_v41 }
 0x3fb   : > { %v2044_v30 = vrot.slane %v2043_v10, 1  ;;  %v2086_v59 = vrot.slane %v2085_v48, 1  ;;  %v2163_v23 = vrot.slane %v2162_v58, 1  ;;  %v2324_v31 = vsel %vm1535_vm4, %v3870_v44, %v2323_v26 }
 0x3fc   : > { %v2302_v55 = vsel %vm1533_vm3, %v2017_v54, %v3916_v5  ;;  %v2024_v37 = vadd.f32 %v2023_v14, %v2022_v2  ;;  %v2093_v8 = vrot.slane %v2092_v61, 1  ;;  %v2051_v56 = vrot.slane %v2050_v25, 1 }
 0x3fd   : > { %v2308_v36 = vsel %vm1531_vm2, %v2066_v49, %v2059_v47  ;;  %v2031_v21 = vadd.f32 %v2030_v13, %v2029_v43  ;;  %v2100_v38 = vrot.slane %v2099_v35, 1  ;;  %v2219_v17 = vrot.slane %v2218_v62, 1 }
 0x3fe   : > { %v2038_v3 = vadd.f32 %v2037_v32, %v2036_v12  ;;  %v2080_v57 = vadd.f32 %v2079_v63, %v2078_v42  ;;  %v2107_v11 = vrot.slane %v2106_v4, 1  ;;  %v2325_v46 = vsel %vm1537_vm5, %v3879_v33, %v2324_v31 }
 0x3ff   : > { %v2309_v44 = vsel %vm1533_vm3, %v2073_v28, %v2308_v36  ;;  %v2045_v0 = vadd.f32 %v2044_v30, %v2043_v10  ;;  %v2087_v5 = vadd.f32 %v2086_v59, %v2085_v48  ;;  %v2164_v2 = vadd.f32 %v2163_v23, %v2162_v58 }
 0x400   : > { %v2094_v19 = vadd.f32 %v2093_v8, %v2092_v61  ;;  %v2319_v6 = vsel %vm1539_vm6, %v3877_v51, %v3884_v16  ;;  %v2052_v24 = vadd.f32 %v2051_v56, %v2050_v25  ;;  %v2303_v15 = vsel %vm1535_vm4, %v2024_v37, %v2302_v55 }
 0x401   : > { %v2101_v7 = vadd.f32 %v2100_v38, %v2099_v35  ;;  %v2304_v41 = vsel %vm1537_vm5, %v2031_v21, %v2303_v15  ;;  %v2220_v54 = vadd.f32 %v2219_v17, %v2218_v62  ;;  %v2326_v33 = vsel %vm1539_vm6, %v3886_v9, %v2325_v46 }
 0x402   : > { %v2320_v20 = vsel %vm1541_vm7, %v3881_v27, %v2319_v6  ;;  %v2305_v18 = vsel %vm1539_vm6, %v2038_v3, %v2304_v41  ;;  %v2108_v52 = vadd.f32 %v2107_v11, %v2106_v4  ;;  %v2310_v60 = vsel %vm1535_vm4, %v2080_v57, %v2309_v44 }
 0x403   : > { %v2321_v51 = vsel %vm1543_vm8, %v2164_v2, %v2320_v20  ;;  %v2306_v43 = vsel %vm1541_vm7, %v2045_v0, %v2305_v18  ;;  %v2311_v29 = vsel %vm1537_vm5, %v2087_v5, %v2310_v60  ;;  %v2327_v27 = vsel %vm1541_vm7, %v3935_v45, %v2326_v33 }
 0x404   : > { %v2307_v9 = vsel %vm1543_vm8, %v2052_v24, %v2306_v43  ;;  %v2312_v50 = vsel %vm1539_vm6, %v2094_v19, %v2311_v29  ;;  %v2328_v40 = vsel %vm1543_vm8, %v2220_v54, %v2327_v27 }
 0x405   : > { %v2313_v12 = vsel %vm1541_vm7, %v2101_v7, %v2312_v50 }
 0x406   : > { %v2314_v45 = vsel %vm1543_vm8, %v2108_v52, %v2313_v12 }
 0x411   : > { %v2708_v16 = vpop.f32.mrb[0].mxu1 }
 0x412   : > { %v2376_v39 = vadd.f32 %v2708_v16, %v2321_v51  ;;  %v2367_v22 = vpop.f32.mrb[1].mxu1 }
 0x413   : > { %v2368_v1 = vadd.f32 %v2367_v22, %v2307_v9  ;;  %v2709_v53 = vpop.f32.mrb[2].mxu1 }
 0x414   : > { %2384 = vst.msk [vmem:[%s422_s29 + $0x10] sm:$0xff] %vm570_vm0, %v2376_v39  ;;  %v2379_v42 = vadd.f32 %v2709_v53, %v2328_v40  ;;  %v2370_v34 = vpop.f32.mrb[3].mxu1 }
 0x415   : > { %2382 = vst.msk [vmem:[%s422_s29] sm:$0xff] %vm570_vm0, %v2368_v1  ;;  %v2371_v14 = vadd.f32 %v2370_v34, %v2314_v45 }
 0x416   : > { %2385 = vst.msk [vmem:[%s422_s29 + $0x18] sm:$0xff] %vm570_vm0, %v2379_v42 }
 0x417   : > { %2383 = vst.msk [vmem:[%s422_s29 + $0x8] sm:$0xff] %vm570_vm0, %v2371_v14 }
 0x418   : > { %2874 = shalt.err (!%p2871_p10)
}
 0x419   : > { %s2875_s27 = scalar_lea.hbm %s3984_s20, 512  ;;  %s2879_s29 = scalar_lea.hbm %s4044_s8, 1024 }
 0x41a   : > { %p2876_p11 = scmp.ne.s32.totalorder %s3984_s20, %s2875_s27  ;;  %p2880_p1 = scmp.lt.u32.totalorder %s3984_s20, %s4044_s8 }
 0x41b   : > { %p2881_p2 = scmp.lt.u32.totalorder %s2879_s29, %s2875_s27  ;;  %p2883_p4 = scmp.lt.u32.totalorder %s2875_s27, %s3984_s20 }
 0x41c   : > { %p2877_p12 = pnand %p2876_p11, %p3036_p9 }
 0x41d   : > { %p2882_p3 = por %p2881_p2, %p2880_p1 }
 0x41e   : > { %p2878_p0 = pneg %p2877_p12 }
 0x41f   : > { %p2884_p5 = por %p2883_p4, %p2882_p3 }
 0x421   : > { %p2885_p6 = pnand %p2884_p5, %p2878_p0 }
 0x423   : > { %2888 = shalt.err (!%p2885_p6)
}
 0x424   : > { %s2946_s18 = smov 128   ;;  %s2947_s25 = smov 8  }
 0x425   : > { %2718 = dma.vmem_to_hbm [thread:$0]  (%p3036_p9), %s3977_s15, 512, %s3984_s20, %s3990_s9, %s2946_s18, %s2946_s18, %s2947_s25  }
 0x426 PF: > { %p2724_p7 = scmp.ge.s32.totalorder %s2941_s14, 2  ;;  %s2417_s26 = sand.u32 1, %s2921_s10  }
 0x427   : > { %s2418_s23 = scalar_lea.sflag [#allocation5], %s2417_s26 }
 0x428   : > { %p2721_p8 = pnand %p2724_p7, %p3043_p13 }
 0x42a   : > { %2916 = dma.done.wait (!%p2721_p8), %s2418_s23, 512  }
 0x42b   : > { %2918 = vsyncadd (!%p2721_p8), %s2418_s23, 4294966784  ;;  %s27_s14 = sadd.s32 1, %s2941_s14   ;;  %s4068_s10 = smov %s2925_s11 }
 0x42c   : > { %p24_p10 = scmp.ge.s32.totalorder %s27_s14, 4   ;;  %s4069_s11 = smov %s2929_s0 }
 0x42d   : > { %s4070_s0 = smov %s3049_s22  ;;  %s4071_s12 = smov %s2937_s13 }
 0x42e   : > { %s4072_s13 = smov %s4074_s17  ;;  %26 = sbr.rel (!%p24_p10) target bundleno = 19 (0x13), region = 101 }
 0x435   :  { %2423 = vsyncpa [#allocation5], 1 }
 0x436   :  { %2425 = vsyncpa [#allocation5 + $0x1], 1 }

</bundles_post_ra>
